<compile_context>
chip_gen: v7x
topology: tpu7x:2x2x1
jax: 0.10.0
libtpu: 0.0.40
codegen_flags: <defaults>
</compile_context>

<pallas_src>
import jax
import jax.numpy as jnp
from jax.experimental import pallas as pl
from jax.experimental.pallas import tpu as pltpu


def bottleneck_kernel(x_ref, w1_ref, b1_ref, w2_ref, b2_ref, w3_ref, b3_ref,
                      o_ref):
    H, W, Cin = x_ref.shape[1], x_ref.shape[2], x_ref.shape[3]
    Cmid = w1_ref.shape[1]
    Cout = w3_ref.shape[1]
    f32 = jnp.float32
    bf16 = jnp.bfloat16
    M = H * W

    # ---- conv1 (1x1, BN1 scale folded into w1) + bias + relu ---------------
    x_flat = x_ref[...].reshape(M, Cin)                       # bf16
    h1 = jnp.dot(x_flat, w1_ref[...], preferred_element_type=f32)
    h1 = jnp.maximum(h1 + b1_ref[...], 0.0).astype(bf16)      # (M, Cmid)

    # ---- conv2 (3x3, pad=1, BN2 folded) as one im2col matmul ---------------
    # Pad 2 zero rows top/bottom (1 real conv-pad row + 1 guard row each side
    # so every flat tap offset below stays in range), keep a flat layout.
    zpad = jnp.zeros((2, W, Cmid), bf16)
    h1p = jnp.concatenate([zpad, h1.reshape(H, W, Cmid), zpad], axis=0)
    h1p = h1p.reshape((H + 4) * W, Cmid)                       # ((H+4)*W, Cmid)

    # Column-edge masks (dimension-selected iota, no div/mod): zero the taps
    # that would wrap across the W boundary BEFORE the matmul, i.e. exact
    # zero padding along W.
    col = jax.lax.broadcasted_iota(jnp.int32, (H, W, Cmid), 1).reshape(M, Cmid)
    not_l = col >= 1
    not_r = col <= W - 2
    zero = jnp.zeros((), bf16)

    # Tap (dy, dx) of output pixel m is h1p[m + (dy+1)*W + dx - 1]; the nine
    # taps are concatenated along channels in (dy, dx) order to match the
    # host-side w2 layout (9*Cmid, Cmid).
    taps = []
    for dy in range(3):
        base = (dy + 1) * W
        taps.append(jnp.where(not_l, h1p[base - 1:base - 1 + M, :], zero))  # dx=0
        taps.append(h1p[base:base + M, :])                                   # dx=1
        taps.append(jnp.where(not_r, h1p[base + 1:base + 1 + M, :], zero))  # dx=2
    patches = jnp.concatenate(taps, axis=-1)                   # (M, 9*Cmid)

    h2 = jnp.dot(patches, w2_ref[...], preferred_element_type=f32)
    h2 = jnp.maximum(h2 + b2_ref[...], 0.0).astype(bf16)       # (M, Cmid)

    # ---- conv3 (1x1, BN3 folded) + bias -------------------------------------
    h3 = jnp.dot(h2, w3_ref[...], preferred_element_type=f32) + b3_ref[...]

    # ---- residual add (re-read x from VMEM -> short live range) + relu -----
    ident = x_ref[...].reshape(M, Cin).astype(f32)
    out = jnp.maximum(h3 + ident, 0.0)
    o_ref[...] = out.reshape(1, H, W, Cout).astype(o_ref.dtype)


def _physical_vmem_bytes():
    """Generation-aware physical VMEM (128 MiB v5e/v6e, 64 MiB/TC v7x)."""
    try:
        info = pltpu.get_tpu_info()
        for attr in ("vmem_capacity_bytes", "vmem_bytes", "vmem_capacity"):
            val = getattr(info, attr, None)
            if val:
                return int(val)
    except Exception:
        pass
    return 64 * 2 ** 20  # conservative default (v7x per-core VMEM)


def bottleneck_block(x_nhwc, params, *, out_dtype=jnp.bfloat16):
    """Fused BottleneckBlock forward (eval-mode BN, stride=1, identity
    residual). x_nhwc: (N, H, W, Cin) -> (N, H, W, Cin) in `out_dtype`."""
    w1, b1, w2, b2, w3, b3 = params
    x = x_nhwc.astype(jnp.bfloat16)
    N, H, W, Cin = x.shape
    Cmid = w1.shape[1]
    Cout = w3.shape[1]
    assert Cin == Cout, "identity residual needs in_channels == 4*out_channels"
    assert w2.shape == (9 * Cmid, Cmid), "w2 must be pre-reshaped to (9*Cmid, Cmid)"

    # ---- VMEM budget (whole-image tiles; fits every ResNet-50 stage) -------
    M = H * W
    obytes = jnp.dtype(out_dtype).itemsize
    io_bytes = 2 * (M * Cin * 2) + 2 * (M * Cout * obytes)       # double-buffered
    w_bytes = 2 * ((Cin * Cmid + 9 * Cmid * Cmid + Cmid * Cout) * 2
                   + (2 * Cmid + Cout) * 4)
    work = (M * Cmid * (4 + 2)                 # conv1 f32 acc + bf16 h1
            + (H + 4) * W * Cmid * 2           # padded h1 buffer
            + M * 9 * Cmid * 2                 # im2col patches
            + M * Cmid * (4 + 2)               # conv2 f32 acc + bf16 h2
            + M * Cout * 8)                    # conv3 f32 + out f32
    needed = io_bytes + w_bytes + work
    cap = (_physical_vmem_bytes() * 3) // 4    # headroom under physical VMEM
    if needed > cap:
        # TODO(synk): H-tiled fallback with halo recompute for oversized images.
        raise ValueError(f"whole-image tile needs ~{needed} B VMEM > cap {cap} B")
    vmem_limit = int(max(min(2 * needed, cap), min(32 * 2 ** 20, cap)))

    const = lambda shape: pl.BlockSpec(shape, lambda n: (0,) * len(shape))
    return pl.pallas_call(
        bottleneck_kernel,
        out_shape=jax.ShapeDtypeStruct((N, H, W, Cout), out_dtype),
        grid=(N,),
        in_specs=[
            pl.BlockSpec((1, H, W, Cin), lambda n: (n, 0, 0, 0)),
            const((Cin, Cmid)), const((1, Cmid)),
            const((9 * Cmid, Cmid)), const((1, Cmid)),
            const((Cmid, Cout)), const((1, Cout)),
        ],
        out_specs=pl.BlockSpec((1, H, W, Cout), lambda n: (n, 0, 0, 0)),
        compiler_params=pltpu.CompilerParams(
            # Only grid axis is batch -> v7x megacore splits on batch, never
            # duplicating the per-image x DMA; no-op on single-TC v5e/v6e.
            dimension_semantics=("parallel",),
            vmem_limit_bytes=vmem_limit),
    )(x, w1, b1, w2, b2, w3, b3)


def make_params(key, in_channels, out_channels, eps=1e-5):
    """Deterministic params. Conv weights drawn in PyTorch (O, I, kh, kw)
    layout, converted to matmul-friendly layouts, BN (eval-mode) scale folded
    into the weights, then cast to bf16. Biases kept in f32.
    conv2 weights are returned as (9*Cmid, Cmid) rows ordered (dy, dx, cin)."""
    cmid, cout = out_channels, out_channels * 4
    ks = jax.random.split(key, 15)

    def bn_fold(kg, kb, km, kv, c):
        gamma = 1.0 + 0.1 * jax.random.normal(kg, (c,), jnp.float32)
        beta = 0.1 * jax.random.normal(kb, (c,), jnp.float32)
        mean = 0.1 * jax.random.normal(km, (c,), jnp.float32)
        var = 1.0 + jnp.abs(0.1 * jax.random.normal(kv, (c,), jnp.float32))
        scale = gamma / jnp.sqrt(var + eps)
        bias = beta - mean * scale
        return scale, bias

    conv1_w = 0.1 * jax.random.normal(ks[0], (cmid, in_channels, 1, 1), jnp.float32)
    conv2_w = 0.1 * jax.random.normal(ks[1], (cmid, cmid, 3, 3), jnp.float32)
    conv3_w = 0.1 * jax.random.normal(ks[2], (cout, cmid, 1, 1), jnp.float32)

    s1, b1 = bn_fold(ks[3], ks[4], ks[5], ks[6], cmid)
    s2, b2 = bn_fold(ks[7], ks[8], ks[9], ks[10], cmid)
    s3, b3 = bn_fold(ks[11], ks[12], ks[13], ks[14], cout)

    w1 = jnp.transpose(conv1_w[:, :, 0, 0], (1, 0)) * s1[None, :]         # (Cin, Cmid)
    w2_hwio = jnp.transpose(conv2_w, (2, 3, 1, 0)) * s2[None, None, None, :]  # (3,3,Cmid,Cmid)
    w2 = w2_hwio.reshape(9 * cmid, cmid)                                   # (9*Cmid, Cmid)
    w3 = jnp.transpose(conv3_w[:, :, 0, 0], (1, 0)) * s3[None, :]          # (Cmid, Cout)

    return (w1.astype(jnp.bfloat16), b1.reshape(1, cmid).astype(jnp.float32),
            w2.astype(jnp.bfloat16), b2.reshape(1, cmid).astype(jnp.float32),
            w3.astype(jnp.bfloat16), b3.reshape(1, cout).astype(jnp.float32))


def reference(x_bf16, params):
    """Pure-JAX NHWC reference mirroring the kernel's bf16 intermediates
    (final result in f32; the kernel additionally rounds its output to bf16)."""
    w1, b1, w2, b2, w3, b3 = params
    f32 = jnp.float32
    hi = jax.lax.Precision.HIGHEST
    Cmid = w1.shape[1]
    x = x_bf16.astype(f32)
    h = jnp.einsum('nhwc,co->nhwo', x, w1.astype(f32), precision=hi)
    h = jnp.maximum(h + b1[0], 0.0).astype(jnp.bfloat16).astype(f32)
    w2_hwio = w2.astype(f32).reshape(3, 3, Cmid, Cmid)
    h = jax.lax.conv_general_dilated(
        h, w2_hwio, window_strides=(1, 1), padding='SAME',
        dimension_numbers=('NHWC', 'HWIO', 'NHWC'), precision=hi)
    h = jnp.maximum(h + b2[0], 0.0).astype(jnp.bfloat16).astype(f32)
    h = jnp.einsum('nhwc,co->nhwo', h, w3.astype(f32), precision=hi) + b3[0]
    return jnp.maximum(h + x, 0.0)


if __name__ == "__main__":
    key = jax.random.PRNGKey(0)
    kx, kp = jax.random.split(key)

    # BottleneckBlock(in_channels=64, out_channels=16, stride=1, downsample=None)
    # (small test shapes; production-shape tuning belongs in a benchmark harness)
    N, H, W = 2, 16, 16
    out_channels = 16
    Cin = out_channels * 4          # identity residual requires Cin == 4*out_channels

    x = jax.random.normal(kx, (N, H, W, Cin), jnp.float32).astype(jnp.bfloat16)
    params = make_params(kp, Cin, out_channels)

    out = jax.block_until_ready(bottleneck_block(x, params))
    ref = jax.block_until_ready(reference(x, params))

    assert out.shape == (N, H, W, out_channels * 4)
    assert out.dtype == jnp.bfloat16
    out_f32 = out.astype(jnp.float32)
    max_err = float(jnp.max(jnp.abs(out_f32 - ref)))
    assert jnp.allclose(out_f32, ref, atol=5e-2, rtol=5e-2), max_err

    print("KERNEL_OK")
</pallas_src>

<mosaic_0001>
module attributes {stable_mosaic.version = 11 : i64} {
  func.func @bottleneck_kernel(%arg0: i32, %arg1: memref<1x16x16x64xbf16, #tpu.memory_space<vmem>>, %arg2: memref<64x16xbf16, #tpu.memory_space<vmem>>, %arg3: memref<1x16xf32, #tpu.memory_space<vmem>>, %arg4: memref<144x16xbf16, #tpu.memory_space<vmem>>, %arg5: memref<1x16xf32, #tpu.memory_space<vmem>>, %arg6: memref<16x64xbf16, #tpu.memory_space<vmem>>, %arg7: memref<1x64xf32, #tpu.memory_space<vmem>>, %arg8: memref<1x16x16x64xbf16, #tpu.memory_space<vmem>>) attributes {dimension_semantics = [#tpu.dimension_semantics<parallel>], iteration_bounds = array<i64: 2>, scalar_prefetch = 0 : i64, scratch_operands = 0 : i64, tpu.core_type = #tpu.core_type<tc>, window_params = [{transform_indices = @transform_0, window_bounds = array<i64: 1, 16, 16, 64>}, {pipeline_mode = #tpu.pipeline_mode<synchronous>, transform_indices = @transform_1, window_bounds = array<i64: 64, 16>}, {pipeline_mode = #tpu.pipeline_mode<synchronous>, transform_indices = @transform_2, window_bounds = array<i64: 1, 16>}, {pipeline_mode = #tpu.pipeline_mode<synchronous>, transform_indices = @transform_3, window_bounds = array<i64: 144, 16>}, {pipeline_mode = #tpu.pipeline_mode<synchronous>, transform_indices = @transform_4, window_bounds = array<i64: 1, 16>}, {pipeline_mode = #tpu.pipeline_mode<synchronous>, transform_indices = @transform_5, window_bounds = array<i64: 16, 64>}, {pipeline_mode = #tpu.pipeline_mode<synchronous>, transform_indices = @transform_6, window_bounds = array<i64: 1, 64>}, {transform_indices = @transform_7, window_bounds = array<i64: 1, 16, 16, 64>}]} {
    %c0 = arith.constant 0 : index
    %c0_0 = arith.constant 0 : index
    %c0_1 = arith.constant 0 : index
    %c0_2 = arith.constant 0 : index
    %0 = vector.load %arg1[%c0, %c0_0, %c0_1, %c0_2] : memref<1x16x16x64xbf16, #tpu.memory_space<vmem>>, vector<1x16x16x64xbf16>
    %1 = vector.shape_cast %0 : vector<1x16x16x64xbf16> to vector<256x64xbf16>
    %c0_3 = arith.constant 0 : index
    %c0_4 = arith.constant 0 : index
    %2 = vector.load %arg2[%c0_3, %c0_4] : memref<64x16xbf16, #tpu.memory_space<vmem>>, vector<64x16xbf16>
    %cst = arith.constant dense<0.000000e+00> : vector<256x16xf32>
    %3 = tpu.matmul %1, %2, %cst {dimension_numbers = #tpu.dot_dimension_numbers<[1], [0], [0], [1], [0, 0, 1, 1], [], []>} : vector<256x64xbf16>, vector<64x16xbf16>, vector<256x16xf32> -> vector<256x16xf32>
    %c0_5 = arith.constant 0 : index
    %c0_6 = arith.constant 0 : index
    %4 = vector.load %arg3[%c0_5, %c0_6] : memref<1x16xf32, #tpu.memory_space<vmem>>, vector<1x16xf32>
    %5 = vector.broadcast %4 : vector<1x16xf32> to vector<256x16xf32>
    %6 = arith.addf %3, %5 : vector<256x16xf32>
    %cst_7 = arith.constant 0.000000e+00 : f32
    %7 = vector.broadcast %cst_7 : f32 to vector<256x16xf32>
    %8 = arith.maximumf %6, %7 : vector<256x16xf32>
    %9 = arith.truncf %8 : vector<256x16xf32> to vector<256x16xbf16>
    %cst_8 = arith.constant 0.000000e+00 : bf16
    %10 = vector.broadcast %cst_8 : bf16 to vector<2x16x16xbf16>
    %11 = vector.shape_cast %9 : vector<256x16xbf16> to vector<16x16x16xbf16>
    %12 = tpu.concatenate %10, %11, %10 in 0 : vector<2x16x16xbf16>, vector<16x16x16xbf16>, vector<2x16x16xbf16> -> vector<20x16x16xbf16>
    %13 = vector.shape_cast %12 : vector<20x16x16xbf16> to vector<320x16xbf16>
    %14 = tpu.iota {dimensions = array<i32: 1>} : vector<16x16x16xi32>
    %15 = vector.shape_cast %14 : vector<16x16x16xi32> to vector<256x16xi32>
    %c1_i32 = arith.constant 1 : i32
    %16 = vector.broadcast %c1_i32 : i32 to vector<256x16xi32>
    %17 = arith.cmpi sge, %15, %16 : vector<256x16xi32>
    %c14_i32 = arith.constant 14 : i32
    %18 = vector.broadcast %c14_i32 : i32 to vector<256x16xi32>
    %19 = arith.cmpi sle, %15, %18 : vector<256x16xi32>
    %20 = vector.extract_strided_slice %13 {offsets = [15, 0], sizes = [256, 16], strides = [1, 1]} : vector<320x16xbf16> to vector<256x16xbf16>
    %cst_9 = arith.constant 0.000000e+00 : bf16
    %21 = vector.broadcast %cst_9 : bf16 to vector<256x16xbf16>
    %22 = arith.select %17, %20, %21 : vector<256x16xi1>, vector<256x16xbf16>
    %23 = vector.extract_strided_slice %13 {offsets = [16, 0], sizes = [256, 16], strides = [1, 1]} : vector<320x16xbf16> to vector<256x16xbf16>
    %24 = vector.extract_strided_slice %13 {offsets = [17, 0], sizes = [256, 16], strides = [1, 1]} : vector<320x16xbf16> to vector<256x16xbf16>
    %cst_10 = arith.constant 0.000000e+00 : bf16
    %25 = vector.broadcast %cst_10 : bf16 to vector<256x16xbf16>
    %26 = arith.select %19, %24, %25 : vector<256x16xi1>, vector<256x16xbf16>
    %27 = vector.extract_strided_slice %13 {offsets = [31, 0], sizes = [256, 16], strides = [1, 1]} : vector<320x16xbf16> to vector<256x16xbf16>
    %cst_11 = arith.constant 0.000000e+00 : bf16
    %28 = vector.broadcast %cst_11 : bf16 to vector<256x16xbf16>
    %29 = arith.select %17, %27, %28 : vector<256x16xi1>, vector<256x16xbf16>
    %30 = vector.extract_strided_slice %13 {offsets = [32, 0], sizes = [256, 16], strides = [1, 1]} : vector<320x16xbf16> to vector<256x16xbf16>
    %31 = vector.extract_strided_slice %13 {offsets = [33, 0], sizes = [256, 16], strides = [1, 1]} : vector<320x16xbf16> to vector<256x16xbf16>
    %cst_12 = arith.constant 0.000000e+00 : bf16
    %32 = vector.broadcast %cst_12 : bf16 to vector<256x16xbf16>
    %33 = arith.select %19, %31, %32 : vector<256x16xi1>, vector<256x16xbf16>
    %34 = vector.extract_strided_slice %13 {offsets = [47, 0], sizes = [256, 16], strides = [1, 1]} : vector<320x16xbf16> to vector<256x16xbf16>
    %cst_13 = arith.constant 0.000000e+00 : bf16
    %35 = vector.broadcast %cst_13 : bf16 to vector<256x16xbf16>
    %36 = arith.select %17, %34, %35 : vector<256x16xi1>, vector<256x16xbf16>
    %37 = vector.extract_strided_slice %13 {offsets = [48, 0], sizes = [256, 16], strides = [1, 1]} : vector<320x16xbf16> to vector<256x16xbf16>
    %38 = vector.extract_strided_slice %13 {offsets = [49, 0], sizes = [256, 16], strides = [1, 1]} : vector<320x16xbf16> to vector<256x16xbf16>
    %cst_14 = arith.constant 0.000000e+00 : bf16
    %39 = vector.broadcast %cst_14 : bf16 to vector<256x16xbf16>
    %40 = arith.select %19, %38, %39 : vector<256x16xi1>, vector<256x16xbf16>
    %41 = tpu.concatenate %22, %23, %26, %29, %30, %33, %36, %37, %40 in 1 : vector<256x16xbf16>, vector<256x16xbf16>, vector<256x16xbf16>, vector<256x16xbf16>, vector<256x16xbf16>, vector<256x16xbf16>, vector<256x16xbf16>, vector<256x16xbf16>, vector<256x16xbf16> -> vector<256x144xbf16>
    %c0_15 = arith.constant 0 : index
    %c0_16 = arith.constant 0 : index
    %42 = vector.load %arg4[%c0_15, %c0_16] : memref<144x16xbf16, #tpu.memory_space<vmem>>, vector<144x16xbf16>
    %cst_17 = arith.constant dense<0.000000e+00> : vector<256x16xf32>
    %43 = tpu.matmul %41, %42, %cst_17 {dimension_numbers = #tpu.dot_dimension_numbers<[1], [0], [0], [1], [0, 0, 1, 1], [], []>} : vector<256x144xbf16>, vector<144x16xbf16>, vector<256x16xf32> -> vector<256x16xf32>
    %c0_18 = arith.constant 0 : index
    %c0_19 = arith.constant 0 : index
    %44 = vector.load %arg5[%c0_18, %c0_19] : memref<1x16xf32, #tpu.memory_space<vmem>>, vector<1x16xf32>
    %45 = vector.broadcast %44 : vector<1x16xf32> to vector<256x16xf32>
    %46 = arith.addf %43, %45 : vector<256x16xf32>
    %cst_20 = arith.constant 0.000000e+00 : f32
    %47 = vector.broadcast %cst_20 : f32 to vector<256x16xf32>
    %48 = arith.maximumf %46, %47 : vector<256x16xf32>
    %49 = arith.truncf %48 : vector<256x16xf32> to vector<256x16xbf16>
    %c0_21 = arith.constant 0 : index
    %c0_22 = arith.constant 0 : index
    %50 = vector.load %arg6[%c0_21, %c0_22] : memref<16x64xbf16, #tpu.memory_space<vmem>>, vector<16x64xbf16>
    %cst_23 = arith.constant dense<0.000000e+00> : vector<256x64xf32>
    %51 = tpu.matmul %49, %50, %cst_23 {dimension_numbers = #tpu.dot_dimension_numbers<[1], [0], [0], [1], [0, 0, 1, 1], [], []>} : vector<256x16xbf16>, vector<16x64xbf16>, vector<256x64xf32> -> vector<256x64xf32>
    %c0_24 = arith.constant 0 : index
    %c0_25 = arith.constant 0 : index
    %52 = vector.load %arg7[%c0_24, %c0_25] : memref<1x64xf32, #tpu.memory_space<vmem>>, vector<1x64xf32>
    %53 = vector.broadcast %52 : vector<1x64xf32> to vector<256x64xf32>
    %54 = arith.addf %51, %53 : vector<256x64xf32>
    %c0_26 = arith.constant 0 : index
    %c0_27 = arith.constant 0 : index
    %c0_28 = arith.constant 0 : index
    %c0_29 = arith.constant 0 : index
    %55 = vector.load %arg1[%c0_26, %c0_27, %c0_28, %c0_29] : memref<1x16x16x64xbf16, #tpu.memory_space<vmem>>, vector<1x16x16x64xbf16>
    %56 = vector.shape_cast %55 : vector<1x16x16x64xbf16> to vector<256x64xbf16>
    %57 = arith.extf %56 : vector<256x64xbf16> to vector<256x64xf32>
    %58 = arith.addf %54, %57 : vector<256x64xf32>
    %cst_30 = arith.constant 0.000000e+00 : f32
    %59 = vector.broadcast %cst_30 : f32 to vector<256x64xf32>
    %60 = arith.maximumf %58, %59 : vector<256x64xf32>
    %61 = vector.shape_cast %60 : vector<256x64xf32> to vector<1x16x16x64xf32>
    %62 = arith.truncf %61 : vector<1x16x16x64xf32> to vector<1x16x16x64xbf16>
    %c0_31 = arith.constant 0 : index
    %c0_32 = arith.constant 0 : index
    %c0_33 = arith.constant 0 : index
    %c0_34 = arith.constant 0 : index
    %63 = vector.load %arg8[%c0_31, %c0_32, %c0_33, %c0_34] : memref<1x16x16x64xbf16, #tpu.memory_space<vmem>>, vector<1x16x16x64xbf16>
    tpu.vector_store %arg8[%c0_31, %c0_32, %c0_33, %c0_34], %62 {strides = array<i32>} : memref<1x16x16x64xbf16, #tpu.memory_space<vmem>>, vector<1x16x16x64xbf16>,
    return
  }
  func.func @transform_0(%arg0: i32) -> (i32, i32, i32, i32) {
    %c0_i32 = arith.constant 0 : i32
    %c0_i32_0 = arith.constant 0 : i32
    %c0_i32_1 = arith.constant 0 : i32
    %c0_i32_2 = arith.constant 0 : i32
    return %arg0, %c0_i32, %c0_i32_0, %c0_i32_1 : i32, i32, i32, i32
  }
  func.func @transform_1(%arg0: i32) -> (i32, i32) {
    %c0_i32 = arith.constant 0 : i32
    %c0_i32_0 = arith.constant 0 : i32
    %c0_i32_1 = arith.constant 0 : i32
    return %c0_i32, %c0_i32_0 : i32, i32
  }
  func.func @transform_2(%arg0: i32) -> (i32, i32) {
    %c0_i32 = arith.constant 0 : i32
    %c0_i32_0 = arith.constant 0 : i32
    %c0_i32_1 = arith.constant 0 : i32
    return %c0_i32, %c0_i32_0 : i32, i32
  }
  func.func @transform_3(%arg0: i32) -> (i32, i32) {
    %c0_i32 = arith.constant 0 : i32
    %c0_i32_0 = arith.constant 0 : i32
    %c0_i32_1 = arith.constant 0 : i32
    return %c0_i32, %c0_i32_0 : i32, i32
  }
  func.func @transform_4(%arg0: i32) -> (i32, i32) {
    %c0_i32 = arith.constant 0 : i32
    %c0_i32_0 = arith.constant 0 : i32
    %c0_i32_1 = arith.constant 0 : i32
    return %c0_i32, %c0_i32_0 : i32, i32
  }
  func.func @transform_5(%arg0: i32) -> (i32, i32) {
    %c0_i32 = arith.constant 0 : i32
    %c0_i32_0 = arith.constant 0 : i32
    %c0_i32_1 = arith.constant 0 : i32
    return %c0_i32, %c0_i32_0 : i32, i32
  }
  func.func @transform_6(%arg0: i32) -> (i32, i32) {
    %c0_i32 = arith.constant 0 : i32
    %c0_i32_0 = arith.constant 0 : i32
    %c0_i32_1 = arith.constant 0 : i32
    return %c0_i32, %c0_i32_0 : i32, i32
  }
  func.func @transform_7(%arg0: i32) -> (i32, i32, i32, i32) {
    %c0_i32 = arith.constant 0 : i32
    %c0_i32_0 = arith.constant 0 : i32
    %c0_i32_1 = arith.constant 0 : i32
    %c0_i32_2 = arith.constant 0 : i32
    return %arg0, %c0_i32, %c0_i32_0, %c0_i32_1 : i32, i32, i32, i32
  }
}

</mosaic_0001>

<bundles_post_ra>
// kernel: tpu_custom_call.1
= control target key start
LH: loop header
LB: loop body
LE: loop exit
PB: predicated region body
PF: predicated region fallthrough
CT: control target
= control target key end

     0   :  { %12 = vsyncpa [#allocation3], 0  ;;  %s4645_s0 = inlined_call_operand.hbm [shape: bf16[2,16,16,64], index: 0, kind: input, shape index: {}]   ;;  %s4646_s1 = inlined_call_operand.vmem [shape: bf16[64,16], index: 1, kind: input, shape index: {}]   ;;  %s4647_s2 = inlined_call_operand.vmem [shape: f32[1,16], index: 2, kind: input, shape index: {}]   ;;  %s4648_s3 = inlined_call_operand.vmem [shape: bf16[144,16], index: 3, kind: input, shape index: {}]   ;;  %s4649_s4 = inlined_call_operand.vmem [shape: f32[1,16], index: 4, kind: input, shape index: {}]   ;;  %s4650_s5 = inlined_call_operand.vmem [shape: bf16[16,64], index: 5, kind: input, shape index: {}]   ;;  %s4651_s6 = inlined_call_operand.vmem [shape: f32[1,64], index: 6, kind: input, shape index: {}]   ;;  %s4652_s7 = inlined_call_operand.hbm [shape: bf16[2,16,16,64], index: 7, kind: output, shape index: {}]  }
   0x1   :  { %14 = vsyncpa [#allocation3 + $0x1], 0 }
   0x2   :  { %15 = vsyncpa [#allocation4], 0 }
   0x3   :  { %17 = vsyncpa [#allocation4 + $0x1], 0  ;;  %s3241_s24 = smov 0   ;;  %s3243_s25 = smov 0  }
   0x4   :  { %s3245_s26 = smov 0   ;;  %s3247_s27 = smov 0  }
   0x5 LB: > { %s3262_s28 = sadd.s32 4294967295, %s3185_s27   ;;  %s2672_s29 = sadd.s32 4294967294, %s3185_s27   ;;  %s3185_s27 = sphi %s3247_s27, %s4697_s27   ;;  %s3181_s26 = sphi %s3245_s26, %s4696_s26   ;;  %s3177_s25 = sphi %s3243_s25, %s4695_s25   ;;  %s3173_s24 = sphi %s3241_s24, %s4694_s24  }
   0x6   : > { %s3266_s30 = sadd.s32 1, %s3185_s27   ;;  %s30_s8 = sadd.s32 1, %s3181_s26 }
   0x7   : > { %s27_s9 = ssub.s32 %s3185_s27, %s3266_s30  ;;  %p37_p0 = scmp.ne.s32.totalorder %s3181_s26, %s3177_s25 }
   0x8   : > { %p28_p1 = scmp.eq.s32.totalorder %s27_s9, 0  ;;  %p38_p2 = scmp.eq.s32.totalorder %s3185_s27, 0 }
   0x9   : > { %p43_p3 = scmp.ne.s32.totalorder %s3177_s25, %s3173_s24  ;;  %p44_p4 = scmp.eq.s32.totalorder %s3262_s28, 0 }
   0xa   : > { %s3278_s10 = scalar_select %p28_p1, %s3181_s26, %s30_s8  }
   0xb   : > { %p3280_p5 = por %p38_p2, %p37_p0  ;;  %p3284_p6 = por %p44_p4, %p43_p3 }
   0xc   : > { %p193_p7 = scmp.eq.s32.totalorder %s3262_s28, 1  ;;  %p199_p8 = scmp.eq.s32.totalorder %s2672_s29, 1 }
   0xd   : > { %p2976_p10 = scmp.lt.s32.totalorder %s3185_s27, 2  ;;  %s237_s15 = sand.u32 1, %s3181_s26  }
   0xe   : > { %p3291_p11 = por %p193_p7, %p37_p0  ;;  %p3295_p12 = por %p199_p8, %p43_p3 }
   0xf   : > { %s2801_s16 = sshll.u32 %s3185_s27, 11  ;;  %s2675_s17 = sshll.u32 %s237_s15, 7 }
  0x10   : > { %s4668_s13 = scalar_select %p3291_p11, 1, 0 }
  0x11   : > { %s4669_s14 = scalar_select %p3295_p12, 1, 0 }
  0x12   : > { %s3304_s20 = scalar_lea.hbm %s4645_s0, %s2801_s16  ;;  %s241_s21 = scalar_lea.vmem [#allocation2], %s2675_s17 }
  0x13   : > { %s248_s22 = sshll.u32 %s241_s21, 4  ;;  %p3308_p13 = pnand %p2976_p10, %p3280_p5  ;;  %s3312_s22 = int_to_ptr.vmem [resolvable:$true] %s248_s22 }
  0x14   : > { %s3314_s29 = scalar_lea.sflag [#allocation3], %s237_s15  ;;  %s3089_s8 = scalar_lea.hbm %s3304_s20, 2048 }
  0x15   : > { %p3090_p0 = scmp.ne.s32.totalorder %s3304_s20, %s3089_s8  ;;  %p3091_p1 = pneg %p3308_p13 }
  0x16   : > { %s3094_s16 = scalar_lea.hbm %s4645_s0, 4096  ;;  %p3095_p4 = scmp.lt.u32.totalorder %s3304_s20, %s4645_s0 }
  0x17   : > { %p3092_p2 = pnand %p3091_p1, %p3090_p0  ;;  %p3096_p5 = scmp.lt.u32.totalorder %s3094_s16, %s3089_s8 }
  0x18   : > { %p3098_p8 = scmp.lt.u32.totalorder %s3089_s8, %s3304_s20 }
  0x19   : > { %p3093_p3 = pneg %p3092_p2  ;;  %p3097_p7 = por %p3096_p5, %p3095_p4 }
  0x1b   : > { %p3099_p10 = por %p3098_p8, %p3097_p7 }
  0x1d   : > { %p3100_p9 = pnand %p3099_p10, %p3093_p3 }
  0x1f   : > { %3103 = shalt.err (!%p3100_p9)
}
  0x20   : > { %s3104_s15 = scalar_lea.vmem %s3312_s22, 2048  ;;  %s3187_s19 = smov [#allocation2]  }
  0x21   : > { %p3105_p0 = scmp.ne.s32.totalorder %s3312_s22, %s3104_s15  ;;  %s3109_s21 = sshll.u32 %s3187_s19, 4  ;;  %s3110_s21 = int_to_ptr.vmem [resolvable:$false] %s3109_s21 }
  0x22   : > { %s3111_s9 = scalar_lea.vmem %s3110_s21, 4096  ;;  %p3112_p11 = scmp.lt.s32.totalorder %s3312_s22, %s3110_s21 }
  0x23   : > { %p3107_p2 = pnand %p3105_p0, %p3091_p1  ;;  %p3113_p4 = scmp.lt.s32.totalorder %s3111_s9, %s3104_s15 }
  0x25   : > { %p3108_p12 = pneg %p3107_p2  ;;  %p3114_p5 = por %p3113_p4, %p3112_p11 }
  0x27   : > { %p3115_p7 = pnand %p3114_p5, %p3108_p12 }
  0x29   : > { %3118 = shalt.err (!%p3115_p7)
}
  0x2a   : > { %s3188_s8 = smov 64   ;;  %s3189_s11 = smov 4  }
  0x2b   : > { %2971 = dma.hbm_to_vmem [thread:$0]  (!%p3308_p13), %s3304_s20, 2048, %s3312_s22, %s3314_s29, %s3188_s8, %s3188_s8, %s3189_s11  }
  0x2c   : > { %p2678_p9 = scmp.ge.s32.totalorder %s3185_s27, 1  ;;  %p256_p1 = scmp.lt.s32.totalorder %s3185_s27, 3 }
  0x2e   : > { %p257_p3 = pnand %p2678_p9, %p256_p1 }
  0x30   : > { %260 = sbr.rel (%p257_p3) target bundleno = 1114 (0x45a), region = 48 }
  0x37   : > { %s3345_s16 = sand.u32 1, %s3177_s25  }
  0x38   : > { %s2679_s17 = sshll.u32 %s3345_s16, 7  ;;  %s263_s18 = scalar_lea.sflag [#allocation3], %s3345_s16 }
  0x39   : > { %s3351_s15 = scalar_lea.vmem [#allocation2], %s2679_s17 }
  0x3a   : > { %3164 = dma.done.wait (%p3284_p6), %s263_s18, 2048  }
  0x3b   : > { %3166 = vsyncadd (%p3284_p6), %s263_s18, 4294965248  ;;  %v3027_v0 = vld [vmem:[%s4646_s1] sm:$0xff]   ;;  %v3028_v1 = vld [vmem:[%s4646_s1 + $0x8] sm:$0xff]   ;;  %vm451_vm0 = vcmask 523264   ;;  %v4655_v20 = vmov 0   ;;  %s3191_s8 = smov 32   ;;  %v709_v22 = vlaneseq }
  0x3c   : > { %2872 = vmatprep.subr.bf16.mxu0 %v3027_v0  ;;  %v3029_v2 = vld [vmem:[%s4646_s1 + $0x10] sm:$0xff]   ;;  %v300_v3 = vld [vmem:[%s3351_s15] sm:$0xff]   ;;  %v3030_v4 = vld [vmem:[%s4646_s1 + $0x18] sm:$0xff]   ;;  %2946 = vmatprep.subr.bf16.mxu1 %v4655_v20  ;;  %v3404_v21 = vrot.slane %v4655_v20, 1  ;;  %s3192_s11 = smov 48   ;;  %vm3193_vm3 = vmmov 1  }
  0x3d   : > { %2873 = vmatpush3.bf16.msra.mxu0 %v3027_v0  ;;  %2880 = vmatprep.mubr.msk.bf16.mxu0 %vm451_vm0, %v300_v3  ;;  %v302_v5 = vld [vmem:[%s3351_s15 + $0x8] sm:$0xff]   ;;  %v304_v6 = vld [vmem:[%s3351_s15 + $0x10] sm:$0xff]   ;;  %v306_v7 = vld [vmem:[%s3351_s15 + $0x18] sm:$0xff]   ;;  %v710_v23 = vshrl.u32 %v709_v22, 7  ;;  %vm723_vm7 = vsmask.f32 7424 }
  0x3e   : > { %2874 = vmatprep.subr.bf16.mxu0 %v3028_v1  ;;  %v308_v8 = vld [vmem:[%s3351_s15 + $0x20] sm:$0xff]   ;;  %v310_v9 = vld [vmem:[%s3351_s15 + $0x28] sm:$0xff]   ;;  %v312_v10 = vld [vmem:[%s3351_s15 + $0x30] sm:$0xff]   ;;  %1004 = vrot.lane.b32.xlu0 %v3404_v21, %s3191_s8  ;;  %vm756_vm8 = vsmask.f32 256  ;;  %s3194_s22 = smov 96  }
  0x3f   : > { %v314_v11 = vld [vmem:[%s3351_s15 + $0x38] sm:$0xff]   ;;  %v316_v12 = vld [vmem:[%s3351_s15 + $0x40] sm:$0xff]   ;;  %v318_v13 = vld [vmem:[%s3351_s15 + $0x48] sm:$0xff]   ;;  %vm712_vm1 = vcmp.ge.s32.totalorder %v710_v23, 1  ;;  %v711_v24 = vadd.s32 8, %v710_v23  ;;  %vm970_vm13 = vcmask 1046528  }
  0x40   : > { %v320_v14 = vld [vmem:[%s3351_s15 + $0x50] sm:$0xff]   ;;  %v322_v15 = vld [vmem:[%s3351_s15 + $0x58] sm:$0xff]   ;;  %v324_v16 = vld [vmem:[%s3351_s15 + $0x60] sm:$0xff]   ;;  %s3195_s23 = smov 16   ;;  %vm1246_vm14 = vcmask 130048   ;;  %s3196_s29 = smov 80  }
  0x41   : > { %2875 = vmatpush3.bf16.msra.mxu0 %v3028_v1  ;;  %v326_v17 = vld [vmem:[%s3351_s15 + $0x68] sm:$0xff]   ;;  %v328_v18 = vld [vmem:[%s3351_s15 + $0x70] sm:$0xff]   ;;  %v330_v19 = vld [vmem:[%s3351_s15 + $0x78] sm:$0xff]   ;;  %vm715_vm5 = vcmp.le.s32.totalorder %v711_v24, 14  ;;  %s3197_s12 = smov 112   ;;  %s3198_s21 = smov 64  }
  0x42   : > { %2876 = vmatprep.subr.bf16.mxu0 %v3029_v2  ;;  %1054 = vrot.lane.b32.xlu0 %v4655_v20, %s3192_s11  ;;  %vm716_vm2 = vmpackc.low %vm712_vm1, %vm712_vm1  ;;  %v3416_v34 = vld [vmem:[%s4647_s2] ss:$0 sm:$0xff]  ;;  %s4484_s9 = scalar_lea.vmem [#allocation5], %s2679_s17  ;;  %s2834_s17 = sshll.u32 %s3262_s28, 11 }
  0x43   : > { %vm717_vm4 = vmpackc.low %vm3193_vm3, %vm3193_vm3  ;;  %v718_v25 = vsel %vm716_vm2, 65537, %v4655_v20  ;;  %vm1296_vm2 = vcmask 261120   ;;  %vm1331_vm3 = vcmask 392192   ;;  %s4591_s19 = scalar_lea.hbm %s4652_s7, %s2834_s17  ;;  %s2586_s28 = scalar_lea.sflag [#allocation4], %s3345_s16 }
  0x44   : > { %v719_v26 = vsel %vm717_vm4, 65537, %v4655_v20  ;;  %vm750_vm6 = vmpackc.low %vm715_vm5, %vm715_vm5  ;;  %vm1400_vm4 = vcmask 654336   ;;  %vm1435_vm5 = vcmask 785408   ;;  %p4691_p11 = scmp.ne.s32.totalorder %s4668_s13, 0 }
  0x45   : > { %2877 = vmatpush3.bf16.msra.mxu0 %v3029_v2  ;;  %v2718_v27 = vcombine.low %v718_v25, %v719_v26  ;;  %v752_v28 = vsel %vm750_vm6, 65537, %v4655_v20  ;;  %vm1470_vm6 = vcmask 916480  }
  0x46   : > { %2878 = vmatprep.subr.bf16.mxu0 %v3030_v4  ;;  %v2719_v30 = vcombine.low %v719_v26, %v752_v28 }
  0x47   : > { %v727_v29 = vshll.u32 %v2718_v27, 16  ;;  %v725_v31 = vshrl.u32 %v2718_v27, 16 }
  0x48   : > { %v758_v33 = vshrl.u32 %v2719_v30, 16  ;;  %v761_v37 = vshll.u32 %v2719_v30, 16 }
  0x49   : > { %2879 = vmatpush3.bf16.msra.mxu0 %v3030_v4  ;;  %v729_v32 = vrot.slane %v727_v29, 1 }
  0x4a   : > { %1895 = vmatprep.subr.bf16.mxu0 %v4655_v20  ;;  %v3420_v36 = vrot.slane %v758_v33, 7 }
  0x4b   : > { %v3418_v35 = vor.u32 %v729_v32, %v725_v31  ;;  %vm788_vm11 = vcmp.ne.s16.totalorder %v729_v32, 0 }
  0x4c   : > { %2881 = vmatmul.mubr.msk.bf16.vlgmr.msra.gmra.mrb[0].mxu0 %vm451_vm0, %v302_v5  ;;  %v763_v44 = vor.u32 %v761_v37, %v3420_v36  ;;  %vm766_vm15 = vcmp.ne.s16.totalorder %v3420_v36, 0 }
  0x4d   : > { %2884 = vmatprep.mubr.msk.bf16.mxu0 %vm451_vm0, %v304_v6  ;;  %v3426_v43 = vsel %vm723_vm7, %v3418_v35, %v729_v32  ;;  %vm733_vm1 = vcmp.ne.s16.totalorder %v3418_v35, 0 }
  0x4e   : > { %vm732_vm9 = vcmp.ne.s16.totalorder %v3426_v43, 0  ;;  %v3434_v52 = vsel %vm756_vm8, %v3420_v36, %v763_v44  ;;  %vm785_vm10 = vcmp.ne.s16.totalorder %v763_v44, 0 }
  0x4f   : > { %vm765_vm12 = vcmp.ne.s16.totalorder %v3434_v52, 0 }
  0x54   : > { %2885 = vmatmul.mubr.msk.bf16.gmra.mrb[4].mxu0 %vm451_vm0, %v306_v7 }
  0x55   : > { %2888 = vmatprep.mubr.msk.bf16.mxu0 %vm451_vm0, %v308_v8 }
  0x5c   : > { %2889 = vmatmul.mubr.msk.bf16.gmra.mrb[8].mxu0 %vm451_vm0, %v310_v9 }
  0x5d   : > { %2892 = vmatprep.mubr.msk.bf16.mxu0 %vm451_vm0, %v312_v10 }
  0x64   : > { %2893 = vmatmul.mubr.msk.bf16.gmra.mrb[12].mxu0 %vm451_vm0, %v314_v11 }
  0x65   : > { %2896 = vmatprep.mubr.msk.bf16.mxu0 %vm451_vm0, %v316_v12 }
  0x6c   : > { %2897 = vmatmul.mubr.msk.bf16.gmra.mrb[16].mxu0 %vm451_vm0, %v318_v13 }
  0x6d   : > { %2900 = vmatprep.mubr.msk.bf16.mxu0 %vm451_vm0, %v320_v14 }
  0x74   : > { %2901 = vmatmul.mubr.msk.bf16.gmra.mrb[20].mxu0 %vm451_vm0, %v322_v15 }
  0x75   : > { %2904 = vmatprep.mubr.msk.bf16.mxu0 %vm451_vm0, %v324_v16 }
  0x7c   : > { %2905 = vmatmul.mubr.msk.bf16.gmra.mrb[24].mxu0 %vm451_vm0, %v326_v17 }
  0x7d   : > { %2908 = vmatprep.mubr.msk.bf16.mxu0 %vm451_vm0, %v328_v18 }
  0x84   : > { %2909 = vmatmul.mubr.msk.bf16.gmra.mrb[28].mxu0 %vm451_vm0, %v330_v19 }
 0x11f   : > { %v2882_v38 = vpop.f32.mrb[0].mxu0 }
 0x120   : > { %v543_v39 = vadd.f32 %v2882_v38, %v3416_v34  ;;  %v534_v40 = vpop.f32.mrb[1].mxu0 }
 0x121   : > { %v535_v41 = vadd.f32 %v3416_v34, %v534_v40  ;;  %v2883_v42 = vpop.f32.mrb[2].mxu0 }
 0x122   : > { %v546_v45 = vadd.f32 %v2883_v42, %v3416_v34  ;;  %v537_v46 = vpop.f32.mrb[3].mxu0  ;;  %v663_v48 = vmax.f32 %v543_v39, 0.0 }
 0x123   : > { %v538_v47 = vadd.f32 %v3416_v34, %v537_v46  ;;  %v661_v50 = vmax.f32 %v535_v41, 0.0 }
 0x124   : > { %v664_v49 = vmax.f32 %v546_v45, 0.0 }
 0x125   : > { %v662_v51 = vmax.f32 %v538_v47, 0.0 }
 0x126   : > { %v3436_v53 = vpack.c.bf16 %v664_v49, %v663_v48 }
 0x127   : > { %v3438_v54 = vpack.c.bf16 %v662_v51, %v661_v50  ;;  %v2886_v55 = vpop.f32.mrb[4].mxu0 }
 0x128   : > { %v559_v56 = vadd.f32 %v2886_v55, %v3416_v34  ;;  %v550_v57 = vpop.f32.mrb[5].mxu0  ;;  %v3444_v58 = vsel %vm732_vm9, %v3436_v53, 0  ;;  %v3449_v59 = vsel %vm785_vm10, %v3436_v53, 0  ;;  %v808_v63 = vshll.u32 %v3436_v53, 16 }
 0x129   : > { %v551_v60 = vadd.f32 %v3416_v34, %v550_v57  ;;  %1175 = vrot.lane.b32.xlu0 %v3444_v58, %s3194_s22  ;;  %1058 = vrot.lane.b32.xlu1 %v3444_v58, %s3192_s11  ;;  %v2887_v61 = vpop.f32.mrb[6].mxu0  ;;  %v800_v62 = vshll.u32 %v3438_v54, 16  ;;  %v3462_v3 = vsel %vm732_vm9, %v3438_v54, 0  ;;  %v1243_v4 = vrot.slane %v3449_v59, 1 }
 0x12a   : > { %v667_v0 = vmax.f32 %v559_v56, 0.0  ;;  %v562_v1 = vadd.f32 %v2887_v61, %v3416_v34  ;;  %v553_v2 = vpop.f32.mrb[7].mxu0  ;;  %v786_v8 = vsel %vm785_vm10, %v3438_v54, 0  ;;  %v789_v10 = vsel %vm788_vm11, %v3438_v54, 0 }
 0x12b   : > { %v665_v5 = vmax.f32 %v551_v60, 0.0  ;;  %v554_v6 = vadd.f32 %v3416_v34, %v553_v2  ;;  %v3466_v7 = vrot.slane %v800_v62, 1  ;;  %v3472_v11 = vshrl.u32 %v1243_v4, 16 }
 0x12c   : > { %v668_v9 = vmax.f32 %v562_v1, 0.0  ;;  %v3477_v12 = vsel %vm765_vm12, %v3438_v54, 0  ;;  %v768_v15 = vsel %vm765_vm12, %v3436_v53, 0  ;;  %v1132_v19 = vrot.slane %v786_v8, 1  ;;  %v3047_v8 = vld [vmem:[%s4648_s3] sm:$0xff]  }
 0x12d   : > { %v666_v13 = vmax.f32 %v554_v6, 0.0  ;;  %1056 = vrot.lane.b32.xlu0 %v3462_v3, %s3192_s11  ;;  %v803_v14 = vsel %vm723_vm7, %v3404_v21, %v3466_v7  ;;  %v972_v16 = vrot.slane %v3477_v12, 1  ;;  %v974_v22 = vrot.slane %v768_v15, 1  ;;  %2955 = vmatpush1.bf16.msra.mxu1 %v3047_v8 }
 0x12e   : > { %v3488_v17 = vpack.c.bf16 %v668_v9, %v667_v0  ;;  %v3022_v18 = vpack.i.bf16 %v3404_v21, %v803_v14  ;;  %v810_v25 = vrot.slane %v808_v63, 1  ;;  %v1543_v26 = vrot.slane %v3472_v11, 7  ;;  %1896 = vmatpush1.bf16.msra.mxu0 %v3047_v8  ;;  %2947 = vmatprep.subr.bf16.mxu1 %v4655_v20 }
 0x12f   : > { %v3491_v23 = vpack.c.bf16 %v666_v13, %v665_v5  ;;  %v2890_v24 = vpop.f32.mrb[8].mxu0  ;;  %v812_v27 = vshrl.u32 %v3436_v53, 16  ;;  %v3505_v31 = vsel %vm970_vm13, %v972_v16, %v974_v22  ;;  %v804_v32 = vshrl.u32 %v3438_v54, 16  ;;  %1897 = vmatprep.subr.bf16.mxu0 %v4655_v20 }
 0x130   : > { %v575_v28 = vadd.f32 %v2890_v24, %v3416_v34  ;;  %v566_v29 = vpop.f32.mrb[9].mxu0  ;;  %3023 = vrot.lane.b32.xlu1 %v3022_v18, %s3195_s23  ;;  %v3500_v30 = vsel %vm765_vm12, %v3488_v17, 0  ;;  %v3513_v38 = vsel %vm732_vm9, %v3488_v17, 0  ;;  %v3521_v46 = vsel %vm970_vm13, %v1132_v19, %v974_v22 }
 0x131   : > { %v567_v33 = vadd.f32 %v3416_v34, %v566_v29  ;;  %v2891_v37 = vpop.f32.mrb[10].mxu0  ;;  %1173 = vrot.lane.b32.xlu0 %v789_v10, %s3194_s22  ;;  %v769_v39 = vsel %vm765_vm12, %v3491_v23, 0  ;;  %v978_v40 = vrot.slane %v3500_v30, 1  ;;  %v814_v49 = vor.u32 %v812_v27, %v810_v25 }
 0x132   : > { %v671_v41 = vmax.f32 %v575_v28, 0.0  ;;  %v578_v42 = vadd.f32 %v2891_v37, %v3416_v34  ;;  %v569_v44 = vpop.f32.mrb[11].mxu0  ;;  %v976_v45 = vrot.slane %v769_v39, 1  ;;  %v816_v50 = vshll.u32 %v3491_v23, 16 }
 0x133   : > { %v669_v47 = vmax.f32 %v567_v33, 0.0  ;;  %v570_v48 = vadd.f32 %v3416_v34, %v569_v44  ;;  %v806_v0 = vor.u32 %v804_v32, %v3466_v7  ;;  %v820_v6 = vshrl.u32 %v3491_v23, 16 }
 0x134   : > { %v672_v51 = vmax.f32 %v578_v42, 0.0  ;;  %1179 = vrot.lane.b32.xlu1 %v3513_v38, %s3194_s22  ;;  %v1244_v53 = vsel %vm970_vm13, %v1243_v4, %v976_v45  ;;  %v3531_v54 = vsel %vm970_vm13, %v976_v45, %v978_v40  ;;  %v3534_v55 = vsel %vm970_vm13, %v974_v22, %v976_v45  ;;  %v3048_v42 = vld [vmem:[%s4648_s3 + $0x8] sm:$0xff]  }
 0x135   : > { %v670_v56 = vmax.f32 %v570_v48, 0.0  ;;  %1137 = vrot.lane.b32.xlu0 %v1132_v19, %s3196_s29  ;;  %v1545_v57 = vshrl.u32 %v1244_v53, 16  ;;  %v1548_v59 = vshll.u32 %v1244_v53, 16  ;;  %v1560_v60 = vshrl.u32 %v3531_v54, 16  ;;  %2956 = vmatpush1.bf16.msra.mxu1 %v3048_v42 }
 0x136   : > { %v3538_v61 = vpack.c.bf16 %v672_v51, %v671_v41  ;;  %v1563_v62 = vshll.u32 %v3531_v54, 16  ;;  %v818_v63 = vrot.slane %v816_v50, 1  ;;  %v3557_v13 = vsel %vm723_vm7, %v806_v0, %v810_v25  ;;  %1898 = vmatpush1.bf16.msra.mxu0 %v3048_v42  ;;  %2948 = vmatprep.subr.bf16.mxu1 %v4655_v20 }
 0x137   : > { %v3542_v1 = vpack.c.bf16 %v670_v56, %v669_v47  ;;  %v1547_v2 = vrot.slane %v1545_v57, 7  ;;  %v3544_v4 = vrot.slane %v1560_v60, 7  ;;  %v2894_v5 = vpop.f32.mrb[12].mxu0  ;;  %v824_v15 = vshll.u32 %v3488_v17, 16  ;;  %1899 = vmatprep.subr.bf16.mxu0 %v4655_v20 }
 0x138   : > { %1062 = vrot.lane.b32.xlu1 %v3513_v38, %s3192_s11  ;;  %v3553_v9 = vsel %vm723_vm7, %v814_v49, %v818_v63  ;;  %v591_v10 = vadd.f32 %v2894_v5, %v3416_v34  ;;  %v582_v14 = vpop.f32.mrb[13].mxu0  ;;  %v822_v27 = vor.u32 %v820_v6, %v818_v63  ;;  %v3579_v11 = vsel %vm732_vm9, %v3491_v23, 0 }
 0x139   : > { %1208 = vrot.lane.b32.xlu0 %v810_v25, %s3197_s12  ;;  %v1550_v18 = vor.u32 %v1548_v59, %v1547_v2  ;;  %v1565_v19 = vor.u32 %v1563_v62, %v3544_v4  ;;  %v583_v22 = vadd.f32 %v3416_v34, %v582_v14  ;;  %v2895_v24 = vpop.f32.mrb[14].mxu0  ;;  %v826_v33 = vrot.slane %v824_v15, 1 }
 0x13a   : > { %v675_v28 = vmax.f32 %v591_v10, 0.0  ;;  %v594_v29 = vadd.f32 %v2895_v24, %v3416_v34  ;;  %v585_v32 = vpop.f32.mrb[15].mxu0  ;;  %v771_v45 = vsel %vm765_vm12, %v3542_v1, 0  ;;  %v832_v49 = vshll.u32 %v3542_v1, 16 }
 0x13b   : > { %v1551_v37 = vsel %vm756_vm8, %v1543_v26, %v1550_v18  ;;  %v1566_v25 = vsel %vm756_vm8, %v1547_v2, %v1565_v19  ;;  %v673_v39 = vmax.f32 %v583_v22, 0.0  ;;  %v586_v41 = vadd.f32 %v3416_v34, %v585_v32 }
 0x13c   : > { %2730 = vmatprep.mubr.msk.bf16.mxu0 %vm1246_vm14, %v1551_v37  ;;  %2731 = vmatprep.mubr.msk.bf16.mxu1 %vm1246_vm14, %v1566_v25  ;;  %v676_v26 = vmax.f32 %v594_v29, 0.0  ;;  %v3582_v44 = vsel %vm723_vm7, %v822_v27, %v826_v33  ;;  %v980_v48 = vrot.slane %v771_v45, 1  ;;  %v836_v23 = vshrl.u32 %v3542_v1, 16 }
 0x13d   : > { %1177 = vrot.lane.b32.xlu1 %v3579_v11, %s3194_s22  ;;  %1008 = vrot.lane.b32.xlu0 %v3505_v31, %s3191_s8  ;;  %v674_v47 = vmax.f32 %v586_v41, 0.0  ;;  %v840_v51 = vshll.u32 %v3538_v61, 16  ;;  %v772_v53 = vsel %vm765_vm12, %v3538_v61, 0  ;;  %v834_v59 = vrot.slane %v832_v49, 1 }
 0x13e   : > { %v3593_v50 = vpack.c.bf16 %v676_v26, %v675_v28  ;;  %v3604_v31 = vsel %vm970_vm13, %v978_v40, %v980_v48  ;;  %v982_v60 = vrot.slane %v772_v53, 1  ;;  %v973_v62 = vsel %vm970_vm13, %v3404_v21, %v972_v16 }
 0x13f   : > { %v3599_v56 = vpack.c.bf16 %v674_v47, %v673_v39  ;;  %v2898_v57 = vpop.f32.mrb[16].mxu0  ;;  %v828_v30 = vshrl.u32 %v3488_v17, 16  ;;  %v838_v5 = vor.u32 %v836_v23, %v834_v59  ;;  %v842_v6 = vrot.slane %v840_v51, 1  ;;  %v3049_v17 = vld [vmem:[%s4648_s3 + $0x10] sm:$0xff]  }
 0x140   : > { %v607_v63 = vadd.f32 %v2898_v57, %v3416_v34  ;;  %v598_v0 = vpop.f32.mrb[17].mxu0  ;;  %v3619_v12 = vsel %vm970_vm13, %v980_v48, %v982_v60  ;;  %2957 = vmatpush1.bf16.msra.mxu1 %v3049_v17  ;;  %1900 = vmatpush1.bf16.msra.mxu0 %v3049_v17  ;;  %v856_v25 = vshll.u32 %v3593_v50, 16  ;;  %v774_v42 = vsel %vm765_vm12, %v3593_v50, 0 }
 0x141   : > { %1141 = vrot.lane.b32.xlu1 %v3534_v55, %s3196_s29  ;;  %1006 = vrot.lane.b32.xlu0 %v973_v62, %s3191_s8  ;;  %v599_v40 = vadd.f32 %v3416_v34, %v598_v0  ;;  %v2899_v2 = vpop.f32.mrb[18].mxu0  ;;  %v3627_v18 = vsel %vm723_vm7, %v838_v5, %v842_v6  ;;  %v830_v22 = vor.u32 %v828_v30, %v826_v33  ;;  %v773_v24 = vsel %vm765_vm12, %v3599_v56, 0 }
 0x142   : > { %v679_v8 = vmax.f32 %v607_v63, 0.0  ;;  %v610_v16 = vadd.f32 %v2899_v2, %v3416_v34  ;;  %v601_v10 = vpop.f32.mrb[19].mxu0  ;;  %v984_v28 = vrot.slane %v773_v24, 1  ;;  %v848_v29 = vshll.u32 %v3599_v56, 16  ;;  %2949 = vmatprep.subr.bf16.mxu1 %v4655_v20  ;;  %1901 = vmatprep.subr.bf16.mxu0 %v4655_v20 }
 0x143   : > { %v677_v14 = vmax.f32 %v599_v40, 0.0  ;;  %v602_v15 = vadd.f32 %v3416_v34, %v601_v10  ;;  %v3640_v33 = vsel %vm723_vm7, %v830_v22, %v834_v59  ;;  %v852_v37 = vshrl.u32 %v3599_v56, 16 }
 0x144   : > { %v680_v19 = vmax.f32 %v610_v16, 0.0  ;;  %v850_v41 = vrot.slane %v848_v29, 1  ;;  %v858_v47 = vrot.slane %v856_v25, 1  ;;  %v986_v51 = vrot.slane %v774_v42, 1 }
 0x145   : > { %1010 = vrot.lane.b32.xlu1 %v3534_v55, %s3191_s8  ;;  %1139 = vrot.lane.b32.xlu0 %v3521_v46, %s3196_s29  ;;  %v678_v27 = vmax.f32 %v602_v15, 0.0  ;;  %v3649_v46 = vsel %vm970_vm13, %v982_v60, %v984_v28  ;;  %v844_v53 = vshrl.u32 %v3538_v61, 16  ;;  %v860_v22 = vshrl.u32 %v3593_v50, 16 }
 0x146   : > { %v3637_v32 = vpack.c.bf16 %v680_v19, %v679_v8  ;;  %v854_v23 = vor.u32 %v852_v37, %v850_v41  ;;  %v3667_v30 = vsel %vm970_vm13, %v984_v28, %v986_v51 }
 0x147   : > { %v3646_v55 = vpack.c.bf16 %v678_v27, %v677_v14  ;;  %v2902_v39 = vpop.f32.mrb[20].mxu0  ;;  %v846_v2 = vor.u32 %v844_v53, %v842_v6  ;;  %v3051_v14 = vld [vmem:[%s4648_s3 + $0x20] sm:$0xff]   ;;  %v862_v42 = vor.u32 %v860_v22, %v858_v47 }
 0x148   : > { %v623_v26 = vadd.f32 %v2902_v39, %v3416_v34  ;;  %v614_v45 = vpop.f32.mrb[21].mxu0  ;;  %v3664_v0 = vsel %vm723_vm7, %v854_v23, %v858_v47  ;;  %v3682_v16 = vsel %vm765_vm12, %v3637_v32, 0  ;;  %v872_v39 = vshll.u32 %v3637_v32, 16 }
 0x149   : > { %1100 = vrot.lane.b32.xlu1 %v3553_v9, %s3198_s21  ;;  %1096 = vrot.lane.b32.xlu0 %v3466_v7, %s3198_s21  ;;  %v615_v48 = vadd.f32 %v3416_v34, %v614_v45  ;;  %v2903_v49 = vpop.f32.mrb[22].mxu0  ;;  %v3050_v7 = vld [vmem:[%s4648_s3 + $0x18] sm:$0xff]   ;;  %v775_v8 = vsel %vm765_vm12, %v3646_v55, 0  ;;  %v3687_v6 = vsel %vm723_vm7, %v846_v2, %v850_v41  ;;  %v990_v19 = vrot.slane %v3682_v16, 1 }
 0x14a   : > { %v683_v57 = vmax.f32 %v623_v26, 0.0  ;;  %v626_v59 = vadd.f32 %v2903_v49, %v3416_v34  ;;  %v617_v60 = vpop.f32.mrb[23].mxu0  ;;  %v988_v17 = vrot.slane %v775_v8, 1  ;;  %2958 = vmatpush1.bf16.msra.mxu1 %v3050_v7  ;;  %1902 = vmatpush1.bf16.msra.mxu0 %v3050_v7  ;;  %v864_v24 = vshll.u32 %v3646_v55, 16  ;;  %v3052_v49 = vld [vmem:[%s4648_s3 + $0x28] sm:$0xff]  }
 0x14b   : > { %v681_v62 = vmax.f32 %v615_v48, 0.0  ;;  %v618_v63 = vadd.f32 %v3416_v34, %v617_v60  ;;  %2950 = vmatprep.subr.bf16.mxu1 %v4655_v20  ;;  %1903 = vmatprep.subr.bf16.mxu0 %v4655_v20  ;;  %v868_v25 = vshrl.u32 %v3646_v55, 16  ;;  %v1575_v7 = vshrl.u32 %v3604_v31, 16 }
 0x14c   : > { %v684_v40 = vmax.f32 %v626_v59, 0.0  ;;  %v3700_v28 = vsel %vm970_vm13, %v986_v51, %v988_v17  ;;  %v3710_v41 = vsel %vm970_vm13, %v988_v17, %v990_v19  ;;  %v866_v45 = vrot.slane %v864_v24, 1 }
 0x14d   : > { %925 = vrot.lane.b32.xlu1 %v3553_v9, %s3195_s23  ;;  %923 = vrot.lane.b32.xlu0 %v3557_v13, %s3195_s23  ;;  %v682_v5 = vmax.f32 %v618_v63, 0.0  ;;  %4671 = vst [vmem:[#allocation8_spill] sm:$0xff] %v3710_v41  ;;  %v874_v59 = vrot.slane %v872_v39, 1 }
 0x14e   : > { %v3684_v10 = vpack.c.bf16 %v684_v40, %v683_v57  ;;  %2959 = vmatpush1.bf16.msra.mxu1 %v3051_v14  ;;  %1904 = vmatpush1.bf16.msra.mxu0 %v3051_v14  ;;  %v3721_v47 = vsel %vm723_vm7, %v862_v42, %v866_v45  ;;  %v870_v57 = vor.u32 %v868_v25, %v866_v45  ;;  %v876_v25 = vshrl.u32 %v3637_v32, 16 }
 0x14f   : > { %v3692_v15 = vpack.c.bf16 %v682_v5, %v681_v62  ;;  %v2906_v27 = vpop.f32.mrb[24].mxu0  ;;  %2951 = vmatprep.subr.bf16.mxu1 %v4655_v20  ;;  %1905 = vmatprep.subr.bf16.mxu0 %v4655_v20  ;;  %v3053_v5 = vld [vmem:[%s4648_s3 + $0x30] sm:$0xff]  }
 0x150   : > { %v639_v29 = vadd.f32 %v2906_v27, %v3416_v34  ;;  %v630_v37 = vpop.f32.mrb[25].mxu0  ;;  %v3729_v40 = vsel %vm723_vm7, %v870_v57, %v874_v59  ;;  %v3744_v17 = vsel %vm765_vm12, %v3684_v10, 0 }
 0x151   : > { %1212 = vrot.lane.b32.xlu1 %v3582_v44, %s3197_s12  ;;  %1098 = vrot.lane.b32.xlu0 %v3557_v13, %s3198_s21  ;;  %v2907_v26 = vpop.f32.mrb[26].mxu0  ;;  %v631_v51 = vadd.f32 %v3416_v34, %v630_v37  ;;  %v777_v2 = vsel %vm765_vm12, %v3692_v15, 0  ;;  %v994_v24 = vrot.slane %v3744_v17, 1  ;;  %v880_v39 = vshll.u32 %v3692_v15, 16 }
 0x152   : > { %v633_v48 = vpop.f32.mrb[27].mxu0  ;;  %v687_v23 = vmax.f32 %v639_v29, 0.0  ;;  %v642_v53 = vadd.f32 %v2907_v26, %v3416_v34  ;;  %2960 = vmatpush1.bf16.msra.mxu1 %v3052_v49  ;;  %1906 = vmatpush1.bf16.msra.mxu0 %v3052_v49  ;;  %v992_v14 = vrot.slane %v777_v2, 1  ;;  %v1590_v29 = vshrl.u32 %v3619_v12, 16 }
 0x153   : > { %v634_v13 = vadd.f32 %v3416_v34, %v633_v48  ;;  %v685_v60 = vmax.f32 %v631_v51, 0.0  ;;  %2952 = vmatprep.subr.bf16.mxu1 %v4655_v20  ;;  %1907 = vmatprep.subr.bf16.mxu0 %v4655_v20  ;;  %v3762_v26 = vsel %vm732_vm9, %v3538_v61, 0  ;;  %v1577_v49 = vrot.slane %v1575_v7, 7 }
 0x154   : > { %v688_v62 = vmax.f32 %v642_v53, 0.0  ;;  %v3755_v37 = vsel %vm970_vm13, %v990_v19, %v992_v14  ;;  %v3054_v19 = vld [vmem:[%s4648_s3 + $0x38] sm:$0xff]   ;;  %v878_v51 = vor.u32 %v876_v25, %v874_v59  ;;  %v882_v53 = vrot.slane %v880_v39, 1 }
 0x155   : > { %1102 = vrot.lane.b32.xlu1 %v3582_v44, %s3198_s21  ;;  %1060 = vrot.lane.b32.xlu0 %v3579_v11, %s3192_s11  ;;  %v686_v63 = vmax.f32 %v634_v13, 0.0  ;;  %v1593_v61 = vshll.u32 %v3619_v12, 16  ;;  %v1605_v59 = vshrl.u32 %v3649_v46, 16  ;;  %v884_v17 = vshrl.u32 %v3692_v15, 16 }
 0x156   : > { %v3737_v8 = vpack.c.bf16 %v688_v62, %v687_v23  ;;  %2961 = vmatpush1.bf16.msra.mxu1 %v3053_v5  ;;  %1908 = vmatpush1.bf16.msra.mxu0 %v3053_v5  ;;  %v1578_v23 = vshll.u32 %v3604_v31, 16  ;;  %v1592_v62 = vrot.slane %v1590_v29, 7 }
 0x157   : > { %v3739_v16 = vpack.c.bf16 %v686_v63, %v685_v60  ;;  %v2910_v22 = vpop.f32.mrb[28].mxu0  ;;  %2953 = vmatprep.subr.bf16.mxu1 %v4655_v20  ;;  %1909 = vmatprep.subr.bf16.mxu0 %v4655_v20  ;;  %v3783_v63 = vsel %vm723_vm7, %v878_v51, %v882_v53  ;;  %v886_v39 = vor.u32 %v884_v17, %v882_v53  ;;  %v892_v51 = vshrl.u32 %v3684_v10, 16 }
 0x158   : > { %v646_v27 = vpop.f32.mrb[29].mxu0  ;;  %v655_v45 = vadd.f32 %v2910_v22, %v3416_v34  ;;  %v1608_v22 = vshll.u32 %v3649_v46, 16  ;;  %v1580_v53 = vor.u32 %v1578_v23, %v1577_v49  ;;  %v3824_v17 = vsel %vm732_vm9, %v3542_v1, 0 }
 0x159   : > { %927 = vrot.lane.b32.xlu1 %v3582_v44, %s3195_s23  ;;  %1143 = vrot.lane.b32.xlu0 %v3531_v54, %s3196_s29  ;;  %v2911_v42 = vpop.f32.mrb[30].mxu0  ;;  %v3765_v44 = vsel %vm970_vm13, %v992_v14, %v994_v24  ;;  %v647_v57 = vadd.f32 %v3416_v34, %v646_v27  ;;  %v888_v14 = vshll.u32 %v3684_v10, 16  ;;  %v779_v29 = vsel %vm765_vm12, %v3739_v16, 0 }
 0x15a   : > { %4672 = vst [vmem:[#allocation9_spill] sm:$0xff] %v3765_v44  ;;  %v649_v48 = vpop.f32.mrb[31].mxu0  ;;  %v691_v13 = vmax.f32 %v655_v45, 0.0  ;;  %v658_v60 = vadd.f32 %v2911_v42, %v3416_v34  ;;  %2962 = vmatpush1.bf16.msra.mxu1 %v3054_v19  ;;  %1910 = vmatpush1.bf16.msra.mxu0 %v3054_v19  ;;  %v996_v45 = vrot.slane %v779_v29, 1  ;;  %v1595_v23 = vor.u32 %v1593_v61, %v1592_v62 }
 0x15b   : > { %v650_v7 = vadd.f32 %v3416_v34, %v649_v48  ;;  %v689_v2 = vmax.f32 %v647_v57, 0.0  ;;  %v780_v34 = vsel %vm765_vm12, %v3737_v8, 0  ;;  %2954 = vmatprep.subr.bf16.mxu1 %v4655_v20  ;;  %1911 = vmatprep.subr.bf16.mxu0 %v4655_v20  ;;  %v890_v42 = vrot.slane %v888_v14, 1 }
 0x15c   : > { %v692_v5 = vmax.f32 %v658_v60, 0.0  ;;  %v998_v19 = vrot.slane %v780_v34, 1  ;;  %v896_v57 = vshll.u32 %v3739_v16, 16  ;;  %v3810_v60 = vrot.slane %v1605_v59, 7 }
 0x15d   : > { %1183 = vrot.lane.b32.xlu1 %v3762_v26, %s3194_s22  ;;  %1012 = vrot.lane.b32.xlu0 %v3531_v54, %s3191_s8  ;;  %v3055_v54 = vld [vmem:[%s4648_s3 + $0x40] sm:$0xff]   ;;  %v690_v27 = vmax.f32 %v650_v7, 0.0  ;;  %v3816_v7 = vsel %vm970_vm13, %v994_v24, %v996_v45  ;;  %v3828_v59 = vsel %vm756_vm8, %v3544_v4, %v1580_v53  ;;  %v900_v4 = vshrl.u32 %v3739_v16, 16 }
 0x15e   : > { %v3800_v25 = vpack.c.bf16 %v692_v5, %v691_v13  ;;  %v3813_v13 = vsel %vm723_vm7, %v886_v39, %v890_v42  ;;  %2963 = vmatpush1.bf16.msra.mxu1 %v3055_v54  ;;  %1912 = vmatpush1.bf16.msra.mxu0 %v3055_v54  ;;  %v898_v5 = vrot.slane %v896_v57, 1  ;;  %v1610_v14 = vor.u32 %v1608_v22, %v3810_v60 }
 0x15f   : > { %v3806_v48 = vpack.c.bf16 %v690_v27, %v689_v2  ;;  %v894_v2 = vor.u32 %v892_v51, %v890_v42  ;;  %v3839_v54 = vsel %vm756_vm8, %v1577_v49, %v1595_v23  ;;  %v904_v49 = vshll.u32 %v3737_v8, 16 }
 0x160   : > { %v3842_v1 = vsel %vm756_vm8, %v1592_v62, %v1610_v14  ;;  %v902_v62 = vor.u32 %v900_v4, %v898_v5  ;;  %v908_v34 = vshrl.u32 %v3737_v8, 16  ;;  %v1089_v36 = vshll.u32 %v3800_v25, 16 }
 0x161   : > { %1066 = vrot.lane.b32.xlu1 %v3762_v26, %s3192_s11  ;;  %1210 = vrot.lane.b32.xlu0 %v3553_v9, %s3197_s12  ;;  %v3819_v9 = vsel %vm970_vm13, %v996_v45, %v998_v19  ;;  %v3835_v24 = vsel %vm723_vm7, %v894_v2, %v898_v5  ;;  %v781_v61 = vsel %vm765_vm12, %v3806_v48, 0  ;;  %v906_v22 = vrot.slane %v904_v49, 1 }
 0x162   : > { %v1000_v27 = vrot.slane %v781_v61, 1  ;;  %v912_v39 = vshll.u32 %v3806_v48, 16  ;;  %v3922_v5 = vrot.slane %v1089_v36, 1  ;;  %v3943_v14 = vsel %vm733_vm1, %v3806_v48, 0 }
 0x163   : > { %v3870_v42 = vsel %vm723_vm7, %v902_v62, %v906_v22  ;;  %v910_v45 = vor.u32 %v908_v34, %v906_v22  ;;  %4675 = vst [vmem:[#allocation12_spill] sm:$0xff] %v3943_v14  ;;  %v3952_v4 = vsel %vm732_vm9, %v3637_v32, 0  ;;  %v3969_v32 = vsel %vm732_vm9, %v3646_v55, 0 }
 0x164   : > { %v914_v51 = vrot.slane %v912_v39, 1  ;;  %v3881_v53 = vsel %vm970_vm13, %v998_v19, %v1000_v27  ;;  %4676 = vst [vmem:[#allocation13_spill] sm:$0xff] %v3952_v4  ;;  %4677 = vst [vmem:[#allocation14_spill] sm:$0xff] %v3969_v32  ;;  %v4019_v36 = vsel %vm732_vm9, %v3684_v10, 0 }
 0x165   : > { %1145 = vrot.lane.b32.xlu1 %v3604_v31, %s3196_s29  ;;  %1181 = vrot.lane.b32.xlu0 %v3824_v17, %s3194_s22  ;;  %4679 = vst [vmem:[#allocation16_spill] sm:$0xff] %v4019_v36 }
 0x166   : > { %v3878_v57 = vsel %vm723_vm7, %v910_v45, %v914_v51  ;;  %v4004_v45 = vsel %vm732_vm9, %v3692_v15, 0 }
 0x167   : > { %4678 = vst [vmem:[#allocation15_spill] sm:$0xff] %v4004_v45 }
 0x169   : > { %1014 = vrot.lane.b32.xlu1 %v3604_v31, %s3191_s8  ;;  %1064 = vrot.lane.b32.xlu0 %v3824_v17, %s3192_s11  ;;  %v3860_v31 = vsel %vm765_vm12, %v3800_v25, 0 }
 0x16a   : > { %v4654_v29 = vrot.slane %v3860_v31, 1  ;;  %v4681_v35 = vrot.slane %v3860_v31, 1 }
 0x16c   : > { %v3875_v52 = vsel %vm970_vm13, %v1000_v27, %v4654_v29 }
 0x16d   : > { %1216 = vrot.lane.b32.xlu1 %v3627_v18, %s3197_s12  ;;  %1147 = vrot.lane.b32.xlu0 %v3619_v12, %s3196_s29 }
 0x171   : > { %1106 = vrot.lane.b32.xlu1 %v3627_v18, %s3198_s21  ;;  %1016 = vrot.lane.b32.xlu0 %v3619_v12, %s3191_s8  ;;  %v3890_v12 = vsel %vm732_vm9, %v3593_v50, 0  ;;  %v3905_v50 = vsel %vm732_vm9, %v3599_v56, 0 }
 0x172   : > { %4673 = vst [vmem:[#allocation10_spill] sm:$0xff] %v3890_v12  ;;  %4674 = vst [vmem:[#allocation11_spill] sm:$0xff] %v3905_v50 }
 0x175   : > { %931 = vrot.lane.b32.xlu1 %v3627_v18, %s3195_s23  ;;  %1214 = vrot.lane.b32.xlu0 %v3640_v33, %s3197_s12  ;;  %v782_v18 = vsel %vm766_vm15, %v3800_v25, 0 }
 0x176   : > { %v1002_v19 = vrot.slane %v782_v18, 1 }
 0x178   : > { %v3912_v2 = vsel %vm970_vm13, %v1000_v27, %v1002_v19 }
 0x179   : > { %1187 = vrot.lane.b32.xlu1 %v3890_v12, %s3194_s22  ;;  %1104 = vrot.lane.b32.xlu0 %v3640_v33, %s3198_s21 }
 0x17d   : > { %1070 = vrot.lane.b32.xlu1 %v3890_v12, %s3192_s11  ;;  %929 = vrot.lane.b32.xlu0 %v3640_v33, %s3195_s23  ;;  %v916_v33 = vshrl.u32 %v3806_v48, 16 }
 0x17f   : > { %v3920_v56 = vor.u32 %v916_v33, %v914_v51 }
 0x181   : > { %1149 = vrot.lane.b32.xlu1 %v3649_v46, %s3196_s29  ;;  %1185 = vrot.lane.b32.xlu0 %v3905_v50, %s3194_s22  ;;  %v3931_v23 = vsel %vm723_vm7, %v3920_v56, %v3922_v5 }
 0x185   : > { %1018 = vrot.lane.b32.xlu1 %v3649_v46, %s3191_s8  ;;  %1068 = vrot.lane.b32.xlu0 %v3905_v50, %s3192_s11  ;;  %v3938_v46 = vpop.permute.xlu0 %1004 }
 0x189   : > { %1220 = vrot.lane.b32.xlu1 %v3664_v0, %s3197_s12  ;;  %1151 = vrot.lane.b32.xlu0 %v3667_v30, %s3196_s29  ;;  %v3958_v49 = vpop.permute.xlu0 %1054 }
 0x18d   : > { %1110 = vrot.lane.b32.xlu1 %v3664_v0, %s3198_s21  ;;  %1020 = vrot.lane.b32.xlu0 %v3667_v30, %s3191_s8 }
 0x191   : > { %935 = vrot.lane.b32.xlu1 %v3664_v0, %s3195_s23  ;;  %1218 = vrot.lane.b32.xlu0 %v3687_v6, %s3197_s12 }
 0x195   : > { %1191 = vrot.lane.b32.xlu1 %v3952_v4, %s3194_s22  ;;  %1108 = vrot.lane.b32.xlu0 %v3687_v6, %s3198_s21 }
 0x199   : > { %1074 = vrot.lane.b32.xlu1 %v3952_v4, %s3192_s11  ;;  %933 = vrot.lane.b32.xlu0 %v3687_v6, %s3195_s23 }
 0x19b   : > { %v3964_v0 = vpop.permute.xlu0 %1175  ;;  %v1059_v61 = vpop.permute.xlu1 %1058 }
 0x19d   : > { %1072 = vrot.lane.b32.xlu1 %v3969_v32, %s3192_s11  ;;  %1189 = vrot.lane.b32.xlu0 %v3969_v32, %s3194_s22 }
 0x19f   : > { %v3975_v62 = vpop.permute.xlu0 %1056 }
 0x1a1   : > { %1153 = vrot.lane.b32.xlu1 %v3700_v28, %s3196_s29  ;;  %1024 = vrot.lane.b32.xlu0 %v3710_v41, %s3191_s8 }
 0x1a2   : > { %v3024_v6 = vpop.permute.xlu1 %3023 }
 0x1a3   : > { %v3981_v22 = vpop.permute.xlu0 %1173 }
 0x1a5   : > { %1022 = vrot.lane.b32.xlu1 %v3700_v28, %s3191_s8  ;;  %1222 = vrot.lane.b32.xlu0 %v3721_v47, %s3197_s12 }
 0x1a6   : > { %v3987_v55 = vpop.permute.xlu1 %1179 }
 0x1a7   : > { %v1138_v27 = vpop.permute.xlu0 %1137 }
 0x1a9   : > { %1155 = vrot.lane.b32.xlu1 %v3710_v41, %s3196_s29  ;;  %1112 = vrot.lane.b32.xlu0 %v3721_v47, %s3198_s21  ;;  %v3025_v41 = vunpack.i.l.bf16 %v3024_v6 }
 0x1aa   : > { %v3993_v34 = vpop.permute.xlu1 %1062 }
 0x1ab   : > { %v3995_v39 = vpop.permute.xlu0 %1208 }
 0x1ad   : > { %1224 = vrot.lane.b32.xlu1 %v3729_v40, %s3197_s12  ;;  %937 = vrot.lane.b32.xlu0 %v3721_v47, %s3195_s23 }
 0x1af   : > { %v1178_v51 = vpop.permute.xlu1 %1177  ;;  %v1009_v18 = vpop.permute.xlu0 %1008 }
 0x1b1   : > { %1114 = vrot.lane.b32.xlu1 %v3729_v40, %s3198_s21  ;;  %1193 = vrot.lane.b32.xlu0 %v4004_v45, %s3194_s22 }
 0x1b3   : > { %v1142_v19 = vpop.permute.xlu1 %1141  ;;  %v1007_v33 = vpop.permute.xlu0 %1006 }
 0x1b5   : > { %939 = vrot.lane.b32.xlu1 %v3729_v40, %s3195_s23  ;;  %1076 = vrot.lane.b32.xlu0 %v4004_v45, %s3192_s11  ;;  %v3026_v40 = vunpack.i.h.bf16 %v3024_v6 }
 0x1b7   : > { %v4014_v47 = vpop.permute.xlu1 %1010  ;;  %v1140_v15 = vpop.permute.xlu0 %1139 }
 0x1b9   : > { %1195 = vrot.lane.b32.xlu1 %v4019_v36, %s3194_s22  ;;  %1159 = vrot.lane.b32.xlu0 %v3765_v44, %s3196_s29 }
 0x1bb   : > { %v1101_v29 = vpop.permute.xlu1 %1100  ;;  %v1097_v20 = vpop.permute.xlu0 %1096 }
 0x1bd   : > { %1078 = vrot.lane.b32.xlu1 %v4019_v36, %s3192_s11  ;;  %1028 = vrot.lane.b32.xlu0 %v3765_v44, %s3191_s8  ;;  %v1248_v36 = vsel %vm1246_vm14, 0, %v3026_v40 }
 0x1bf   : > { %v4029_v14 = vpop.permute.xlu1 %925  ;;  %v924_v45 = vpop.permute.xlu0 %923 }
 0x1c0   : > { %v1253_v10 = vsel %vm1246_vm14, %v3462_v3, %v924_v45  ;;  %v1298_v3 = vsel %vm1296_vm2, %v1248_v36, %v3938_v46 }
 0x1c1   : > { %v1302_v4 = vsel %vm1296_vm2, %v1253_v10, %v1009_v18  ;;  %1157 = vrot.lane.b32.xlu1 %v3755_v37, %s3196_s29  ;;  %1116 = vrot.lane.b32.xlu0 %v3783_v63, %s3198_s21  ;;  %v1333_v46 = vsel %vm1331_vm3, %v1298_v3, %v3958_v49 }
 0x1c2   : > { %v1337_v44 = vsel %vm1331_vm3, %v1302_v4, %v1059_v61  ;;  %v4051_v4 = vsel %vm732_vm9, %v3739_v16, 0  ;;  %v1250_v61 = vsel %vm1246_vm14, 0, %v3025_v41  ;;  %v1367_v18 = vsel %vm451_vm0, %v1333_v46, %v1097_v20 }
 0x1c3   : > { %v1213_v32 = vpop.permute.xlu1 %1212  ;;  %v1371_v12 = vsel %vm451_vm0, %v1337_v44, %v1101_v29  ;;  %v1099_v50 = vpop.permute.xlu0 %1098  ;;  %v1300_v6 = vsel %vm1296_vm2, %v1250_v61, %v1007_v33  ;;  %v1402_v41 = vsel %vm1400_vm4, %v1367_v18, %v1138_v27 }
 0x1c4   : > { %v1406_v45 = vsel %vm1400_vm4, %v1371_v12, %v1142_v19  ;;  %v1335_v33 = vsel %vm1331_vm3, %v1300_v6, %v3975_v62 }
 0x1c5   : > { %1026 = vrot.lane.b32.xlu1 %v3755_v37, %s3191_s8  ;;  %941 = vrot.lane.b32.xlu0 %v3783_v63, %s3195_s23  ;;  %v1441_v12 = vsel %vm1435_vm5, %v1406_v45, %v1178_v51  ;;  %v1369_v20 = vsel %vm451_vm0, %v1335_v33, %v1099_v50 }
 0x1c6   : > { %v1476_v49 = vsel %vm1470_vm6, %v1441_v12, %v1213_v32  ;;  %v1404_v32 = vsel %vm1400_vm4, %v1369_v20, %v1140_v15 }
 0x1c7   : > { %v4053_v44 = vpop.permute.xlu1 %1102  ;;  %v1061_v29 = vpop.permute.xlu0 %1060  ;;  %v1552_v51 = vshrl.u32 %v1476_v49, 16  ;;  %v1555_v45 = vshll.u32 %v1476_v49, 16 }
 0x1c9   : > { %1226 = vrot.lane.b32.xlu1 %v3783_v63, %s3197_s12  ;;  %1197 = vrot.lane.b32.xlu0 %v4051_v4, %s3194_s22  ;;  %v1437_v63 = vsel %vm1435_vm5, %v1402_v41, %v3981_v22  ;;  %v4085_v62 = vrot.slane %v1552_v51, 7  ;;  %v1439_v22 = vsel %vm1435_vm5, %v1404_v32, %v3964_v0  ;;  %v4100_v0 = vsel %vm732_vm9, %v3737_v8, 0 }
 0x1ca   : > { %v1472_v50 = vsel %vm1470_vm6, %v1437_v63, %v3995_v39  ;;  %v1256_v63 = vsel %vm1246_vm14, %v3444_v58, %v4029_v14  ;;  %v783_v58 = vsel %vm732_vm9, %v3806_v48, 0 }
 0x1cb   : > { %v928_v16 = vpop.permute.xlu1 %927  ;;  %v1144_v19 = vpop.permute.xlu0 %1143  ;;  %v1530_v15 = vshrl.u32 %v1472_v50, 16  ;;  %v1557_v39 = vor.u32 %v1555_v45, %v4085_v62  ;;  %v1304_v51 = vsel %vm1296_vm2, %v1256_v63, %v4014_v47 }
 0x1cc   : > { %v1339_v50 = vsel %vm1331_vm3, %v1304_v51, %v1061_v29 }
 0x1cd   : > { %1228 = vrot.lane.b32.xlu1 %v3813_v13, %s3197_s12  ;;  %1080 = vrot.lane.b32.xlu0 %v4051_v4, %s3192_s11  ;;  %v1532_v41 = vrot.slane %v1530_v15, 7  ;;  %v1373_v14 = vsel %vm451_vm0, %v1339_v50, %v4053_v44 }
 0x1cf   : > { %v4076_v36 = vpop.permute.xlu1 %1183  ;;  %v1013_v27 = vpop.permute.xlu0 %1012 }
 0x1d1   : > { %1118 = vrot.lane.b32.xlu1 %v3813_v13, %s3198_s21  ;;  %1163 = vrot.lane.b32.xlu0 %v3819_v9, %s3196_s29 }
 0x1d3   : > { %v4087_v40 = vpop.permute.xlu1 %1066  ;;  %v1211_v10 = vpop.permute.xlu0 %1210 }
 0x1d4   : > { %v1474_v3 = vsel %vm1470_vm6, %v1439_v22, %v1211_v10  ;;  %v1408_v10 = vsel %vm1400_vm4, %v1373_v14, %v1144_v19 }
 0x1d5   : > { %v1533_v61 = vshrl.u32 %v1474_v3, 16  ;;  %943 = vrot.lane.b32.xlu1 %v3813_v13, %s3195_s23  ;;  %1032 = vrot.lane.b32.xlu0 %v3819_v9, %s3191_s8  ;;  %v1536_v6 = vshll.u32 %v1474_v3, 16  ;;  %v1443_v48 = vsel %vm1435_vm5, %v1408_v10, %v3987_v55  ;;  %v1093_v10 = vshrl.u32 %v3800_v25, 16 }
 0x1d7   : > { %v1535_v46 = vrot.slane %v1533_v61, 7  ;;  %v1146_v18 = vpop.permute.xlu1 %1145  ;;  %v1182_v12 = vpop.permute.xlu0 %1181 }
 0x1d9   : > { %v1538_v49 = vor.u32 %v1536_v6, %v1535_v46  ;;  %1199 = vrot.lane.b32.xlu1 %v4100_v0, %s3194_s22  ;;  %1230 = vrot.lane.b32.xlu0 %v3835_v24, %s3197_s12  ;;  %v1558_v13 = vsel %vm756_vm8, %v1535_v46, %v1557_v39 }
 0x1da   : > { %1936 = vmatmul.mubr.bf16.vlgmr.msra.gmra.mrb[0].mxu1 %v1558_v13 }
 0x1db   : > { %v1015_v33 = vpop.permute.xlu1 %1014  ;;  %2732 = vmatprep.mubr.msk.bf16.mxu1 %vm1246_vm14, %v3828_v59  ;;  %v4109_v20 = vpop.permute.xlu0 %1064  ;;  %v1539_v8 = vsel %vm756_vm8, %v1532_v41, %v1538_v49 }
 0x1dc   : > { %1928 = vmatmul.mubr.bf16.vlgmr.msra.gmra.mrb[32].mxu0 %v1539_v8 }
 0x1dd   : > { %1082 = vrot.lane.b32.xlu1 %v4100_v0, %s3192_s11  ;;  %1120 = vrot.lane.b32.xlu0 %v3835_v24, %s3198_s21 }
 0x1df   : > { %v1217_v32 = vpop.permute.xlu1 %1216  ;;  %v4121_v59 = vpop.permute.xlu0 %1147 }
 0x1e1   : > { %1161 = vrot.lane.b32.xlu1 %v3816_v7, %s3196_s29  ;;  %945 = vrot.lane.b32.xlu0 %v3835_v24, %s3195_s23  ;;  %v1259_v24 = vsel %vm1246_vm14, %v3579_v11, %v928_v16 }
 0x1e2   : > { %v1306_v44 = vsel %vm1296_vm2, %v1259_v24, %v1013_v27 }
 0x1e3   : > { %v1107_v22 = vpop.permute.xlu1 %1106  ;;  %v4133_v47 = vpop.permute.xlu0 %1016  ;;  %v1341_v11 = vsel %vm1331_vm3, %v1306_v44, %v3993_v34 }
 0x1e5   : > { %1030 = vrot.lane.b32.xlu1 %v3816_v7, %s3191_s8  ;;  %1201 = vrot.lane.b32.xlu0 %v783_v58, %s3194_s22 }
 0x1e7   : > { %v932_v29 = vpop.permute.xlu1 %931  ;;  %v1215_v3 = vpop.permute.xlu0 %1214 }
 0x1e8   : > { %v1478_v15 = vsel %vm1470_vm6, %v1443_v48, %v1215_v3 }
 0x1e9   : > { %v1567_v45 = vshrl.u32 %v1478_v15, 16  ;;  %1232 = vrot.lane.b32.xlu1 %v3870_v42, %s3197_s12  ;;  %1084 = vrot.lane.b32.xlu0 %v783_v58, %s3192_s11  ;;  %v1570_v61 = vshll.u32 %v1478_v15, 16 }
 0x1eb   : > { %v1569_v19 = vrot.slane %v1567_v45, 7  ;;  %v4148_v39 = vpop.permute.xlu1 %1187  ;;  %v1105_v16 = vpop.permute.xlu0 %1104 }
 0x1ec   : > { %v1375_v55 = vsel %vm451_vm0, %v1341_v11, %v1105_v16 }
 0x1ed   : > { %v1572_v46 = vor.u32 %v1570_v61, %v1569_v19  ;;  %v1410_v27 = vsel %vm1400_vm4, %v1375_v55, %v1146_v18  ;;  %1122 = vrot.lane.b32.xlu1 %v3870_v42, %s3198_s21  ;;  %1167 = vrot.lane.b32.xlu0 %v3875_v52, %s3196_s29 }
 0x1ee   : > { %v1445_v6 = vsel %vm1435_vm5, %v1410_v27, %v1182_v12 }
 0x1ef   : > { %v1480_v41 = vsel %vm1470_vm6, %v1445_v6, %v1217_v32  ;;  %v4160_v49 = vpop.permute.xlu1 %1070  ;;  %v930_v13 = vpop.permute.xlu0 %929  ;;  %v1573_v34 = vsel %vm756_vm8, %v4085_v62, %v1572_v46  ;;  %v790_v62 = vsel %vm732_vm9, %v3800_v25, 0  ;;  %v4680_v6 = vmov 0  }
 0x1f0   : > { %1944 = vmatmul.mubr.bf16.gmra.mrb[4].mxu1 %v1573_v34  ;;  %v1582_v8 = vshrl.u32 %v1480_v41, 16  ;;  %v1585_v12 = vshll.u32 %v1480_v41, 16  ;;  %v1262_v32 = vsel %vm1246_vm14, %v3513_v38, %v930_v13  ;;  %v1638_v34 = vshll.u32 %v3700_v28, 16 }
 0x1f1   : > { %947 = vrot.lane.b32.xlu1 %v3870_v42, %s3195_s23  ;;  %1234 = vrot.lane.b32.xlu0 %v3878_v57, %s3197_s12 }
 0x1f2   : > { %2733 = vmatprep.mubr.msk.bf16.mxu1 %vm1246_vm14, %v3839_v54  ;;  %v1584_v18 = vrot.slane %v1582_v8, 7  ;;  %v1308_v54 = vsel %vm1296_vm2, %v1262_v32, %v1015_v33  ;;  %v1095_v33 = vor.u32 %v1093_v10, %v3922_v5  ;;  %v1265_v5 = vsel %vm1246_vm14, %v3824_v17, %v932_v29 }
 0x1f3   : > { %v1150_v63 = vpop.permute.xlu1 %1149  ;;  %v1186_v51 = vpop.permute.xlu0 %1185  ;;  %v1343_v43 = vsel %vm1331_vm3, %v1308_v54, %v4109_v20  ;;  %v1620_v20 = vshrl.u32 %v3667_v30, 16  ;;  %v1310_v61 = vsel %vm1296_vm2, %v1265_v5, %v4133_v47  ;;  %v1635_v17 = vshrl.u32 %v3700_v28, 16 }
 0x1f4   : > { %v1587_v50 = vor.u32 %v1585_v12, %v1584_v18  ;;  %v1377_v48 = vsel %vm451_vm0, %v1343_v43, %v1107_v22 }
 0x1f5   : > { %1203 = vrot.lane.b32.xlu1 %v790_v62, %s3194_s22  ;;  %1124 = vrot.lane.b32.xlu0 %v3878_v57, %s3198_s21  ;;  %v1412_v44 = vsel %vm1400_vm4, %v1377_v48, %v4121_v59  ;;  %v1622_v45 = vrot.slane %v1620_v20, 7  ;;  %v1637_v13 = vrot.slane %v1635_v17, 7 }
 0x1f6   : > { %v1588_v42 = vsel %vm756_vm8, %v1569_v19, %v1587_v50  ;;  %v1447_v22 = vsel %vm1435_vm5, %v1412_v44, %v4076_v36  ;;  %v1623_v19 = vshll.u32 %v3667_v30, 16  ;;  %v1345_v30 = vsel %vm1331_vm3, %v1310_v61, %v4087_v40 }
 0x1f7   : > { %v1019_v58 = vpop.permute.xlu1 %1018  ;;  %v1069_v14 = vpop.permute.xlu0 %1068  ;;  %v1640_v10 = vor.u32 %v1638_v34, %v1637_v13 }
 0x1f8   : > { %1952 = vmatmul.mubr.bf16.gmra.mrb[8].mxu1 %v1588_v42  ;;  %v1625_v55 = vor.u32 %v1623_v19, %v1622_v45 }
 0x1f9   : > { %1165 = vrot.lane.b32.xlu1 %v3881_v53, %s3196_s29  ;;  %949 = vrot.lane.b32.xlu0 %v3878_v57, %s3195_s23  ;;  %v1641_v20 = vsel %vm756_vm8, %v1622_v45, %v1640_v10 }
 0x1fa   : > { %2734 = vmatprep.mubr.msk.bf16.mxu1 %vm1246_vm14, %v3842_v1  ;;  %v1207_v1 = vsel %vm723_vm7, %v1095_v33, %v3404_v21 }
 0x1fb   : > { %v1221_v38 = vpop.permute.xlu1 %1220  ;;  %v4189_v24 = vpop.permute.xlu0 %1151 }
 0x1fd   : > { %1034 = vrot.lane.b32.xlu1 %v3881_v53, %s3191_s8  ;;  %1036 = vrot.lane.b32.xlu0 %v3912_v2, %s3191_s8 }
 0x1ff   : > { %v1111_v57 = vpop.permute.xlu1 %1110  ;;  %v4197_v3 = vpop.permute.xlu0 %1020 }
 0x201   : > { %951 = vrot.lane.b32.xlu1 %v3920_v56, %s3195_s23  ;;  %1238 = vrot.lane.b32.xlu0 %v1207_v1, %s3197_s12  ;;  %v4683_v1 = vld [vmem:[#allocation11_spill] sm:$0xff] }
 0x203   : > { %v936_v2 = vpop.permute.xlu1 %935  ;;  %v1219_v15 = vpop.permute.xlu0 %1218 }
 0x204   : > { %v1482_v59 = vsel %vm1470_vm6, %v1447_v22, %v1219_v15  ;;  %v1271_v44 = vsel %vm1246_vm14, %v4683_v1, %v936_v2 }
 0x205   : > { %v1597_v11 = vshrl.u32 %v1482_v59, 16  ;;  %1236 = vrot.lane.b32.xlu1 %v3931_v23, %s3197_s12  ;;  %1128 = vrot.lane.b32.xlu0 %v1095_v33, %s3198_s21  ;;  %v1600_v29 = vshll.u32 %v1482_v59, 16  ;;  %v4682_v33 = vld [vmem:[#allocation8_spill] sm:$0xff]  ;;  %v1314_v45 = vsel %vm1296_vm2, %v1271_v44, %v4197_v3 }
 0x206   : > { %v1650_v48 = vshrl.u32 %v4682_v33, 16  ;;  %v1653_v19 = vshll.u32 %v4682_v33, 16  ;;  %v1349_v17 = vsel %vm1331_vm3, %v1314_v45, %v4160_v49  ;;  %v3056_v44 = vld [vmem:[%s4650_s5] sm:$0xff]  }
 0x207   : > { %v1599_v56 = vrot.slane %v1597_v11, 7  ;;  %v4219_v36 = vpop.permute.xlu1 %1191  ;;  %v1109_v16 = vpop.permute.xlu0 %1108  ;;  %2912 = vmatprep.subr.bf16.mxu0 %v3056_v44 }
 0x208   : > { %v1379_v47 = vsel %vm451_vm0, %v1345_v30, %v1109_v16  ;;  %v1652_v15 = vrot.slane %v1650_v48, 7  ;;  %2913 = vmatpush3.bf16.msra.mxu0 %v3056_v44 }
 0x209   : > { %v1602_v46 = vor.u32 %v1600_v29, %v1599_v56  ;;  %v1414_v27 = vsel %vm1400_vm4, %v1379_v47, %v1150_v63  ;;  %1126 = vrot.lane.b32.xlu1 %v3931_v23, %s3198_s21  ;;  %1205 = vrot.lane.b32.xlu0 %v4680_v6, %s3194_s22  ;;  %v784_v23 = vsel %vm733_vm1, %v3800_v25, 0  ;;  %v4252_v25 = vsel %vm970_vm13, %v4681_v35, %v3404_v21 }
 0x20a   : > { %v1449_v41 = vsel %vm1435_vm5, %v1414_v27, %v1186_v51  ;;  %v1626_v51 = vsel %vm756_vm8, %v3810_v60, %v1625_v55  ;;  %v1665_v29 = vshrl.u32 %v3755_v37, 16  ;;  %v1655_v30 = vor.u32 %v1653_v19, %v1652_v15 }
 0x20b   : > { %v1484_v40 = vsel %vm1470_vm6, %v1449_v41, %v1221_v38  ;;  %v4232_v8 = vpop.permute.xlu1 %1074  ;;  %v934_v12 = vpop.permute.xlu0 %933  ;;  %v1603_v32 = vsel %vm756_vm8, %v1584_v18, %v1602_v46  ;;  %v1668_v41 = vshll.u32 %v3755_v37, 16 }
 0x20c   : > { %v1268_v63 = vsel %vm1246_vm14, %v3762_v26, %v934_v12  ;;  %1960 = vmatmul.mubr.bf16.gmra.mrb[12].mxu1 %v1603_v32  ;;  %v1612_v62 = vshrl.u32 %v1484_v40, 16  ;;  %v1615_v42 = vshll.u32 %v1484_v40, 16  ;;  %v4280_v6 = vrot.slane %v1665_v29, 7  ;;  %v4687_v29 = vld [vmem:[#allocation13_spill] sm:$0xff] }
 0x20d   : > { %v1312_v28 = vsel %vm1296_vm2, %v1268_v63, %v1019_v58  ;;  %1086 = vrot.lane.b32.xlu1 %v784_v23, %s3192_s11  ;;  %2735 = vmatprep.mubr.msk.bf16.mxu1 %vm1246_vm14, %v1626_v51  ;;  %v1656_v34 = vsel %vm756_vm8, %v1637_v13, %v1655_v30  ;;  %s3199_s11 = smov [#allocation5]  }
 0x20e   : > { %v1347_v18 = vsel %vm1331_vm3, %v1312_v28, %v1069_v14  ;;  %v1614_v50 = vrot.slane %v1612_v62, 7  ;;  %v1670_v51 = vor.u32 %v1668_v41, %v4280_v6  ;;  %s3123_s22 = sshll.u32 %s3199_s11, 4  ;;  %s3124_s22 = int_to_ptr.vmem [resolvable:$false] %s3123_s22 }
 0x20f   : > { %v4246_v26 = vpop.permute.xlu1 %1072  ;;  %v1190_v54 = vpop.permute.xlu0 %1189  ;;  %v1381_v58 = vsel %vm451_vm0, %v1347_v18, %v1111_v57  ;;  %s3125_s23 = scalar_lea.vmem %s3124_s22, 4096 }
 0x210   : > { %v1617_v60 = vor.u32 %v1615_v42, %v1614_v50  ;;  %v1416_v31 = vsel %vm1400_vm4, %v1381_v58, %v4189_v24  ;;  %v1671_v37 = vsel %vm756_vm8, %v1652_v15, %v1670_v51 }
 0x211   : > { %1169 = vrot.lane.b32.xlu1 %v4252_v25, %s3196_s29  ;;  %v1451_v5 = vsel %vm1435_vm5, %v1416_v31, %v4148_v39 }
 0x212   : > { %v1618_v14 = vsel %vm756_vm8, %v1599_v56, %v1617_v60 }
 0x213   : > { %v1154_v43 = vpop.permute.xlu1 %1153  ;;  %v1025_v38 = vpop.permute.xlu0 %1024 }
 0x214   : > { %1968 = vmatmul.mubr.bf16.gmra.mrb[16].mxu1 %v1618_v14 }
 0x215   : > { %1240 = vrot.lane.b32.xlu1 %v3404_v21, %s3197_s12  ;;  %2736 = vmatprep.mubr.msk.bf16.mxu1 %vm1246_vm14, %v1641_v20 }
 0x217   : > { %v1023_v57 = vpop.permute.xlu1 %1022  ;;  %v1223_v22 = vpop.permute.xlu0 %1222 }
 0x218   : > { %v1486_v24 = vsel %vm1470_vm6, %v1451_v5, %v1223_v22  ;;  %v4686_v22 = vld [vmem:[#allocation9_spill] sm:$0xff] }
 0x219   : > { %v1627_v61 = vshrl.u32 %v1486_v24, 16  ;;  %v1630_v59 = vshll.u32 %v1486_v24, 16  ;;  %v1680_v15 = vshrl.u32 %v4686_v22, 16 }
 0x21b   : > { %v1629_v2 = vrot.slane %v1627_v61, 7  ;;  %v1156_v11 = vpop.permute.xlu1 %1155  ;;  %v1113_v56 = vpop.permute.xlu0 %1112 }
 0x21c   : > { %v1383_v39 = vsel %vm451_vm0, %v1349_v17, %v1113_v56 }
 0x21d   : > { %v1632_v16 = vor.u32 %v1630_v59, %v1629_v2  ;;  %v1418_v47 = vsel %vm1400_vm4, %v1383_v39, %v1154_v43  ;;  %v4685_v43 = vld [vmem:[#allocation14_spill] sm:$0xff]  ;;  %v1683_v59 = vshll.u32 %v4686_v22, 16 }
 0x21e   : > { %v1453_v3 = vsel %vm1435_vm5, %v1418_v47, %v1190_v54  ;;  %v4684_v54 = vld [vmem:[#allocation10_spill] sm:$0xff] }
 0x21f   : > { %v1225_v55 = vpop.permute.xlu1 %1224  ;;  %v938_v46 = vpop.permute.xlu0 %937  ;;  %v1633_v27 = vsel %vm756_vm8, %v1614_v50, %v1632_v16 }
 0x220   : > { %v1488_v49 = vsel %vm1470_vm6, %v1453_v3, %v1225_v55  ;;  %1976 = vmatmul.mubr.bf16.gmra.mrb[20].mxu1 %v1633_v27  ;;  %v1274_v35 = vsel %vm1246_vm14, %v4684_v54, %v938_v46 }
 0x221   : > { %v1642_v40 = vshrl.u32 %v1488_v49, 16  ;;  %2737 = vmatprep.mubr.msk.bf16.mxu1 %vm1246_vm14, %v1656_v34  ;;  %v1645_v32 = vshll.u32 %v1488_v49, 16  ;;  %v1316_v60 = vsel %vm1296_vm2, %v1274_v35, %v1023_v57 }
 0x222   : > { %v1351_v14 = vsel %vm1331_vm3, %v1316_v60, %v4246_v26 }
 0x223   : > { %v1644_v12 = vrot.slane %v1642_v40, 7  ;;  %v1115_v63 = vpop.permute.xlu1 %1114  ;;  %v1194_v23 = vpop.permute.xlu0 %1193 }
 0x224   : > { %v1385_v31 = vsel %vm451_vm0, %v1351_v14, %v1115_v63 }
 0x225   : > { %v1647_v62 = vor.u32 %v1645_v32, %v1644_v12  ;;  %v1420_v19 = vsel %vm1400_vm4, %v1385_v31, %v1156_v11 }
 0x227   : > { %v940_v28 = vpop.permute.xlu1 %939  ;;  %v1077_v18 = vpop.permute.xlu0 %1076  ;;  %v1648_v50 = vsel %vm756_vm8, %v1629_v2, %v1647_v62  ;;  %v1682_v2 = vrot.slane %v1680_v15, 7  ;;  %v4688_v15 = vld [vmem:[#allocation15_spill] sm:$0xff] }
 0x228   : > { %1984 = vmatmul.mubr.bf16.gmra.mrb[24].mxu1 %v1648_v50  ;;  %v1277_v33 = vsel %vm1246_vm14, %v4685_v43, %v940_v28 }
 0x229   : > { %2738 = vmatprep.mubr.msk.bf16.mxu1 %vm1246_vm14, %v1671_v37  ;;  %v1318_v1 = vsel %vm1296_vm2, %v1277_v33, %v1025_v38  ;;  %v1455_v38 = vsel %vm1435_vm5, %v1420_v19, %v4219_v36  ;;  %v1695_v36 = vshrl.u32 %v3816_v7, 16  ;;  %v1685_v46 = vor.u32 %v1683_v59, %v1682_v2 }
 0x22a   : > { %v1353_v26 = vsel %vm1331_vm3, %v1318_v1, %v4232_v8 }
 0x22b   : > { %v1196_v13 = vpop.permute.xlu1 %1195  ;;  %v1160_v42 = vpop.permute.xlu0 %1159  ;;  %v1697_v51 = vrot.slane %v1695_v36, 7  ;;  %v1686_v28 = vsel %vm756_vm8, %v4280_v6, %v1685_v46 }
 0x22f   : > { %v4293_v10 = vpop.permute.xlu1 %1078  ;;  %v4295_v58 = vpop.permute.xlu0 %1028 }
 0x233   : > { %v1158_v48 = vpop.permute.xlu1 %1157  ;;  %v1117_v20 = vpop.permute.xlu0 %1116 }
 0x234   : > { %v1387_v45 = vsel %vm451_vm0, %v1353_v26, %v1117_v20  ;;  %v1713_v20 = vshll.u32 %v3819_v9, 16 }
 0x235   : > { %v1422_v17 = vsel %vm1400_vm4, %v1387_v45, %v1158_v48 }
 0x236   : > { %v1457_v47 = vsel %vm1435_vm5, %v1422_v17, %v1194_v23  ;;  %v1698_v23 = vshll.u32 %v3816_v7, 16 }
 0x237   : > { %v1027_v57 = vpop.permute.xlu1 %1026  ;;  %v942_v5 = vpop.permute.xlu0 %941 }
 0x238   : > { %v1280_v8 = vsel %vm1246_vm14, %v4687_v29, %v942_v5  ;;  %v1700_v7 = vor.u32 %v1698_v23, %v1697_v51  ;;  %v1725_v29 = vshrl.u32 %v3881_v53, 16 }
 0x239   : > { %v1320_v27 = vsel %vm1296_vm2, %v1280_v8, %v1027_v57  ;;  %v4689_v8 = vld [vmem:[#allocation16_spill] sm:$0xff] }
 0x23a   : > { %v1355_v62 = vsel %vm1331_vm3, %v1320_v27, %v1077_v18  ;;  %v1701_v1 = vsel %vm756_vm8, %v1682_v2, %v1700_v7  ;;  %v1727_v36 = vrot.slane %v1725_v29, 7 }
 0x23b   : > { %v1227_v24 = vpop.permute.xlu1 %1226  ;;  %v4313_v61 = vpop.permute.xlu0 %1197 }
 0x23c   : > { %v1490_v11 = vsel %vm1470_vm6, %v1455_v38, %v1227_v24 }
 0x23d   : > { %v1657_v56 = vshrl.u32 %v1490_v11, 16  ;;  %v1660_v30 = vshll.u32 %v1490_v11, 16 }
 0x23f   : > { %v1659_v39 = vrot.slane %v1657_v56, 7  ;;  %v1229_v16 = vpop.permute.xlu1 %1228  ;;  %v4321_v3 = vpop.permute.xlu0 %1080 }
 0x240   : > { %v1492_v55 = vsel %vm1470_vm6, %v1457_v47, %v1229_v16 }
 0x241   : > { %v1662_v41 = vor.u32 %v1660_v30, %v1659_v39  ;;  %v1672_v49 = vshrl.u32 %v1492_v55, 16  ;;  %v1675_v50 = vshll.u32 %v1492_v55, 16  ;;  %v1728_v55 = vshll.u32 %v3881_v53, 16 }
 0x243   : > { %v1674_v34 = vrot.slane %v1672_v49, 7  ;;  %v1119_v40 = vpop.permute.xlu1 %1118  ;;  %v1663_v32 = vsel %vm756_vm8, %v1644_v12, %v1662_v41  ;;  %v4327_v63 = vpop.permute.xlu0 %1163  ;;  %v1710_v12 = vshrl.u32 %v3819_v9, 16  ;;  %v1730_v23 = vor.u32 %v1728_v55, %v1727_v36 }
 0x244   : > { %1992 = vmatmul.mubr.bf16.gmra.mrb[28].mxu1 %v1663_v32  ;;  %v1389_v37 = vsel %vm451_vm0, %v1355_v62, %v1119_v40 }
 0x245   : > { %2739 = vmatprep.mubr.msk.bf16.mxu1 %vm1246_vm14, %v1686_v28  ;;  %v1677_v54 = vor.u32 %v1675_v50, %v1674_v34  ;;  %v1424_v14 = vsel %vm1400_vm4, %v1389_v37, %v1160_v42  ;;  %v1712_v48 = vrot.slane %v1710_v12, 7  ;;  %v1743_v12 = vshll.u32 %v3875_v52, 16 }
 0x246   : > { %v1459_v33 = vsel %vm1435_vm5, %v1424_v14, %v1196_v13 }
 0x247   : > { %v944_v35 = vpop.permute.xlu1 %943  ;;  %v4335_v60 = vpop.permute.xlu0 %1032  ;;  %v1678_v18 = vsel %vm756_vm8, %v1659_v39, %v1677_v54  ;;  %v1715_v19 = vor.u32 %v1713_v20, %v1712_v48  ;;  %v1731_v14 = vsel %vm756_vm8, %v1712_v48, %v1730_v23 }
 0x248   : > { %v1283_v13 = vsel %vm1246_vm14, %v4688_v15, %v944_v35 }
 0x249   : > { %v1322_v9 = vsel %vm1296_vm2, %v1283_v13, %v4295_v58  ;;  %v1716_v2 = vsel %vm756_vm8, %v1697_v51, %v1715_v19  ;;  %v1740_v51 = vshrl.u32 %v3875_v52, 16  ;;  %v1755_v19 = vshrl.u32 %v4252_v25, 16 }
 0x24a   : > { %v1357_v59 = vsel %vm1331_vm3, %v1322_v9, %v4293_v10 }
 0x24b   : > { %v1200_v43 = vpop.permute.xlu1 %1199  ;;  %v1231_v6 = vpop.permute.xlu0 %1230  ;;  %v1742_v35 = vrot.slane %v1740_v51, 7 }
 0x24c   : > { %2000 = vmatmul.mubr.bf16.gmra.mrb[32].mxu1 %v1678_v18  ;;  %v1494_v31 = vsel %vm1470_vm6, %v1459_v33, %v1231_v6 }
 0x24d   : > { %v1687_v44 = vshrl.u32 %v1494_v31, 16  ;;  %2740 = vmatprep.mubr.msk.bf16.mxu1 %vm1246_vm14, %v1701_v1  ;;  %v1690_v42 = vshll.u32 %v1494_v31, 16  ;;  %v1745_v6 = vor.u32 %v1743_v12, %v1742_v35 }
 0x24f   : > { %v1689_v57 = vrot.slane %v1687_v44, 7  ;;  %v4345_v5 = vpop.permute.xlu1 %1082  ;;  %v1121_v22 = vpop.permute.xlu0 %1120  ;;  %v1746_v44 = vsel %vm756_vm8, %v1727_v36, %v1745_v6 }
 0x250   : > { %v1391_v17 = vsel %vm451_vm0, %v1357_v59, %v1121_v22 }
 0x251   : > { %v1692_v26 = vor.u32 %v1690_v42, %v1689_v57 }
 0x253   : > { %v1162_v45 = vpop.permute.xlu1 %1161  ;;  %v946_v24 = vpop.permute.xlu0 %945  ;;  %v1693_v38 = vsel %vm756_vm8, %v1674_v34, %v1692_v26 }
 0x254   : > { %2008 = vmatmul.mubr.bf16.gmra.mrb[36].mxu1 %v1693_v38  ;;  %v1426_v58 = vsel %vm1400_vm4, %v1391_v17, %v1162_v45  ;;  %v1286_v39 = vsel %vm1246_vm14, %v4689_v8, %v946_v24  ;;  %v1757_v38 = vrot.slane %v1755_v19, 7 }
 0x255   : > { %2741 = vmatprep.mubr.msk.bf16.mxu1 %vm1246_vm14, %v1716_v2  ;;  %v1461_v16 = vsel %vm1435_vm5, %v1426_v58, %v4313_v61 }
 0x257   : > { %v1031_v11 = vpop.permute.xlu1 %1030  ;;  %v1202_v56 = vpop.permute.xlu0 %1201 }
 0x258   : > { %v1324_v10 = vsel %vm1296_vm2, %v1286_v39, %v1031_v11  ;;  %v1770_v39 = vshrl.u32 %v3404_v21, 16 }
 0x259   : > { %v1359_v40 = vsel %vm1331_vm3, %v1324_v10, %v4321_v3 }
 0x25b   : > { %v1233_v30 = vpop.permute.xlu1 %1232  ;;  %v1085_v47 = vpop.permute.xlu0 %1084 }
 0x25c   : > { %v1496_v46 = vsel %vm1470_vm6, %v1461_v16, %v1233_v30  ;;  %v4690_v30 = vld [vmem:[#allocation12_spill] sm:$0xff] }
 0x25d   : > { %v1702_v27 = vshrl.u32 %v1496_v46, 16  ;;  %v1705_v49 = vshll.u32 %v1496_v46, 16 }
 0x25f   : > { %v1704_v41 = vrot.slane %v1702_v27, 7  ;;  %v1123_v34 = vpop.permute.xlu1 %1122  ;;  %v1168_v32 = vpop.permute.xlu0 %1167 }
 0x260   : > { %v1393_v61 = vsel %vm451_vm0, %v1359_v40, %v1123_v34 }
 0x261   : > { %v1707_v62 = vor.u32 %v1705_v49, %v1704_v41  ;;  %v1428_v53 = vsel %vm1400_vm4, %v1393_v61, %v4327_v63  ;;  %v1773_v61 = vshll.u32 %v3404_v21, 16 }
 0x262   : > { %v1463_v37 = vsel %vm1435_vm5, %v1428_v53, %v1200_v43 }
 0x263   : > { %v948_v28 = vpop.permute.xlu1 %947  ;;  %v1708_v50 = vsel %vm756_vm8, %v1689_v57, %v1707_v62  ;;  %v1235_v54 = vpop.permute.xlu0 %1234 }
 0x264   : > { %2016 = vmatmul.mubr.bf16.gmra.mrb[40].mxu1 %v1708_v50  ;;  %v1498_v3 = vsel %vm1470_vm6, %v1463_v37, %v1235_v54  ;;  %v1289_v52 = vsel %vm1246_vm14, %v4051_v4, %v948_v28 }
 0x265   : > { %v1717_v7 = vshrl.u32 %v1498_v3, 16  ;;  %2742 = vmatprep.mubr.msk.bf16.mxu1 %vm1246_vm14, %v1731_v14  ;;  %v1720_v33 = vshll.u32 %v1498_v3, 16  ;;  %v1326_v57 = vsel %vm1296_vm2, %v1289_v52, %v4335_v60  ;;  %v1758_v60 = vshll.u32 %v4252_v25, 16 }
 0x266   : > { %v1361_v22 = vsel %vm1331_vm3, %v1326_v57, %v4345_v5 }
 0x267   : > { %v1719_v18 = vrot.slane %v1717_v7, 7  ;;  %v1204_v63 = vpop.permute.xlu1 %1203  ;;  %v1125_v20 = vpop.permute.xlu0 %1124 }
 0x268   : > { %v1395_v15 = vsel %vm451_vm0, %v1361_v22, %v1125_v20  ;;  %v4421_v20 = vld [vmem:[%s4649_s4] ss:$0 sm:$0xff] }
 0x269   : > { %v1722_v31 = vor.u32 %v1720_v33, %v1719_v18 }
 0x26b   : > { %v1166_v1 = vpop.permute.xlu1 %1165  ;;  %v1723_v43 = vsel %vm756_vm8, %v1704_v41, %v1722_v31  ;;  %v950_v48 = vpop.permute.xlu0 %949  ;;  %v1772_v41 = vrot.slane %v1770_v39, 7 }
 0x26c   : > { %2024 = vmatmul.mubr.bf16.gmra.mrb[44].mxu1 %v1723_v43  ;;  %v1430_v4 = vsel %vm1400_vm4, %v1395_v15, %v1166_v1  ;;  %v1292_v9 = vsel %vm1246_vm14, %v4100_v0, %v950_v48  ;;  %v1760_v0 = vor.u32 %v1758_v60, %v1757_v38 }
 0x26d   : > { %2743 = vmatprep.mubr.msk.bf16.mxu1 %vm1246_vm14, %v1746_v44  ;;  %v1465_v24 = vsel %vm1435_vm5, %v1430_v4, %v1202_v56  ;;  %v1775_v54 = vor.u32 %v1773_v61, %v1772_v41 }
 0x26e   : > { %v1761_v40 = vsel %vm756_vm8, %v1742_v35, %v1760_v0 }
 0x26f   : > { %v1035_v42 = vpop.permute.xlu1 %1034  ;;  %v1037_v26 = vpop.permute.xlu0 %1036  ;;  %v1776_v21 = vsel %vm756_vm8, %v1757_v38, %v1775_v54 }
 0x270   : > { %v1328_v2 = vsel %vm1296_vm2, %v1292_v9, %v1035_v42 }
 0x271   : > { %v1363_v8 = vsel %vm1331_vm3, %v1328_v2, %v1085_v47 }
 0x273   : > { %v952_v13 = vpop.permute.xlu1 %951  ;;  %v1239_v17 = vpop.permute.xlu0 %1238 }
 0x274   : > { %v1295_v56 = vsel %vm1246_vm14, %v4690_v30, %v952_v13 }
 0x275   : > { %v1330_v27 = vsel %vm1296_vm2, %v1295_v56, %v1037_v26 }
 0x277   : > { %v1237_v45 = vpop.permute.xlu1 %1236  ;;  %v1129_v49 = vpop.permute.xlu0 %1128 }
 0x278   : > { %v1500_v5 = vsel %vm1470_vm6, %v1465_v24, %v1237_v45 }
 0x279   : > { %v1732_v59 = vshrl.u32 %v1500_v5, 16  ;;  %v1735_v29 = vshll.u32 %v1500_v5, 16 }
 0x27b   : > { %v1734_v11 = vrot.slane %v1732_v59, 7  ;;  %v1127_v58 = vpop.permute.xlu1 %1126  ;;  %v1206_v50 = vpop.permute.xlu0 %1205 }
 0x27c   : > { %v1397_v16 = vsel %vm451_vm0, %v1363_v8, %v1127_v58 }
 0x27d   : > { %v1737_v25 = vor.u32 %v1735_v29, %v1734_v11  ;;  %v1432_v36 = vsel %vm1400_vm4, %v1397_v16, %v1168_v32 }
 0x27e   : > { %v1467_v55 = vsel %vm1435_vm5, %v1432_v36, %v1204_v63 }
 0x27f   : > { %v1502_v10 = vsel %vm1470_vm6, %v1467_v55, %v1239_v17  ;;  %v1087_v46 = vpop.permute.xlu1 %1086  ;;  %v1738_v47 = vsel %vm756_vm8, %v1719_v18, %v1737_v25 }
 0x280   : > { %v1365_v34 = vsel %vm1331_vm3, %v1330_v27, %v1087_v46  ;;  %2032 = vmatmul.mubr.bf16.gmra.mrb[48].mxu1 %v1738_v47  ;;  %v1747_v51 = vshrl.u32 %v1502_v10, 16  ;;  %v1750_v23 = vshll.u32 %v1502_v10, 16 }
 0x281   : > { %2744 = vmatprep.mubr.msk.bf16.mxu1 %vm1246_vm14, %v1761_v40  ;;  %v1399_v53 = vsel %vm451_vm0, %v1365_v34, %v1129_v49  ;;  %vm2552_vm0 = vcmask 519168  }
 0x282   : > { %v1749_v32 = vrot.slane %v1747_v51, 7 }
 0x283   : > { %v1170_v62 = vpop.permute.xlu1 %1169 }
 0x284   : > { %v1434_v28 = vsel %vm1400_vm4, %v1399_v53, %v1170_v62  ;;  %v1752_v37 = vor.u32 %v1750_v23, %v1749_v32 }
 0x285   : > { %v1469_v3 = vsel %vm1435_vm5, %v1434_v28, %v1206_v50 }
 0x286   : > { %v1753_v12 = vsel %vm756_vm8, %v1734_v11, %v1752_v37 }
 0x287   : > { %v1241_v35 = vpop.permute.xlu1 %1240 }
 0x288   : > { %v1504_v14 = vsel %vm1470_vm6, %v1469_v3, %v1241_v35  ;;  %2040 = vmatmul.mubr.bf16.gmra.mrb[52].mxu1 %v1753_v12 }
 0x289   : > { %v1762_v7 = vshrl.u32 %v1504_v14, 16  ;;  %2745 = vmatprep.mubr.msk.bf16.mxu1 %vm1246_vm14, %v1776_v21  ;;  %v1765_v33 = vshll.u32 %v1504_v14, 16 }
 0x28b   : > { %v1764_v18 = vrot.slane %v1762_v7, 7 }
 0x28d   : > { %v1767_v63 = vor.u32 %v1765_v33, %v1764_v18 }
 0x28f   : > { %v1768_v6 = vsel %vm756_vm8, %v1749_v32, %v1767_v63 }
 0x290   : > { %2048 = vmatmul.mubr.bf16.gmra.mrb[56].mxu1 %v1768_v6 }
 0x2ad   : > { %v1937_v31 = vpop.f32.mrb[0].mxu1 }
 0x2ae   : > { %v1938_v1 = vadd.f32 %v4421_v20, %v1937_v31  ;;  %v1939_v43 = vpop.f32.mrb[1].mxu1 }
 0x2af   : > { %v1929_v52 = vpop.f32.mrb[32].mxu0  ;;  %v1940_v44 = vpop.f32.mrb[2].mxu1 }
 0x2b0   : > { %v1930_v48 = vadd.f32 %v4421_v20, %v1929_v52  ;;  %v1941_v57 = vadd.f32 %v4421_v20, %v1940_v44  ;;  %v1931_v42 = vpop.f32.mrb[33].mxu0  ;;  %v1942_v22 = vpop.f32.mrb[3].mxu1  ;;  %v2058_v13 = vmax.f32 %v1938_v1, 0.0 }
 0x2b1   : > { %v1932_v15 = vpop.f32.mrb[34].mxu0 }
 0x2b2   : > { %v2059_v19 = vmax.f32 %v1941_v57, 0.0  ;;  %v1933_v4 = vadd.f32 %v4421_v20, %v1932_v15  ;;  %v1934_v26 = vpop.f32.mrb[35].mxu0  ;;  %v2056_v9 = vmax.f32 %v1930_v48, 0.0 }
 0x2b4   : > { %v2089_v45 = vpack.c.bf16 %v2059_v19, %v2058_v13  ;;  %v2057_v24 = vmax.f32 %v1933_v4, 0.0 }
 0x2b6   : > { %v2088_v38 = vpack.c.bf16 %v2057_v24, %v2056_v9 }
 0x2b8   : > { %2914 = vmatprep.mubr.msk.bf16.mxu0 %vm1246_vm14, %v2088_v38 }
 0x2b9   : > { %2915 = vmatmul.mubr.msk.bf16.vlgmr.msra.gmra.mrb[36].mxu0 %vm1246_vm14, %v2089_v45 }
 0x2c3   : > { %v1945_v60 = vpop.f32.mrb[4].mxu1 }
 0x2c4   : > { %v1946_v2 = vadd.f32 %v4421_v20, %v1945_v60  ;;  %v1947_v5 = vpop.f32.mrb[5].mxu1 }
 0x2c5   : > { %v1948_v59 = vpop.f32.mrb[6].mxu1 }
 0x2c6   : > { %v1949_v17 = vadd.f32 %v4421_v20, %v1948_v59  ;;  %v1950_v11 = vpop.f32.mrb[7].mxu1  ;;  %v2060_v29 = vmax.f32 %v1946_v2, 0.0 }
 0x2c8   : > { %v2061_v58 = vmax.f32 %v1949_v17, 0.0 }
 0x2ca   : > { %v2090_v8 = vpack.c.bf16 %v2061_v58, %v2060_v29 }
 0x2cb   : > { %v1953_v39 = vpop.f32.mrb[8].mxu1 }
 0x2cc   : > { %v1954_v0 = vadd.f32 %v4421_v20, %v1953_v39  ;;  %v1955_v30 = vpop.f32.mrb[9].mxu1  ;;  %2918 = vmatprep.mubr.msk.bf16.mxu0 %vm1246_vm14, %v2090_v8 }
 0x2cd   : > { %v1956_v56 = vpop.f32.mrb[10].mxu1 }
 0x2ce   : > { %v1957_v16 = vadd.f32 %v4421_v20, %v1956_v56  ;;  %v1958_v25 = vpop.f32.mrb[11].mxu1  ;;  %v2062_v36 = vmax.f32 %v1954_v0, 0.0 }
 0x2d0   : > { %v2063_v55 = vmax.f32 %v1957_v16, 0.0 }
 0x2d2   : > { %v2091_v10 = vpack.c.bf16 %v2063_v55, %v2062_v36 }
 0x2d4   : > { %2919 = vmatmul.mubr.msk.bf16.gmra.mrb[40].mxu0 %vm1246_vm14, %v2091_v10 }
 0x2df   : > { %v1961_v46 = vpop.f32.mrb[12].mxu1 }
 0x2e0   : > { %v1962_v27 = vadd.f32 %v4421_v20, %v1961_v46  ;;  %v1963_v47 = vpop.f32.mrb[13].mxu1 }
 0x2e1   : > { %v1964_v41 = vpop.f32.mrb[14].mxu1 }
 0x2e2   : > { %v1965_v49 = vadd.f32 %v4421_v20, %v1964_v41  ;;  %v1966_v34 = vpop.f32.mrb[15].mxu1  ;;  %v2064_v40 = vmax.f32 %v1962_v27, 0.0 }
 0x2e4   : > { %v2065_v51 = vmax.f32 %v1965_v49, 0.0 }
 0x2e6   : > { %v2092_v61 = vpack.c.bf16 %v2065_v51, %v2064_v40 }
 0x2e7   : > { %v1969_v32 = vpop.f32.mrb[16].mxu1 }
 0x2e8   : > { %v1970_v23 = vadd.f32 %v4421_v20, %v1969_v32  ;;  %v1971_v62 = vpop.f32.mrb[17].mxu1  ;;  %2922 = vmatprep.mubr.msk.bf16.mxu0 %vm1246_vm14, %v2092_v61 }
 0x2e9   : > { %v1972_v53 = vpop.f32.mrb[18].mxu1 }
 0x2ea   : > { %v1973_v28 = vadd.f32 %v4421_v20, %v1972_v53  ;;  %v1974_v50 = vpop.f32.mrb[19].mxu1  ;;  %v2066_v37 = vmax.f32 %v1970_v23, 0.0 }
 0x2ec   : > { %v2067_v54 = vmax.f32 %v1973_v28, 0.0 }
 0x2ee   : > { %v2093_v12 = vpack.c.bf16 %v2067_v54, %v2066_v37 }
 0x2f0   : > { %2923 = vmatmul.mubr.msk.bf16.gmra.mrb[44].mxu0 %vm1246_vm14, %v2093_v12 }
 0x2f3   : > { %v1977_v3 = vpop.f32.mrb[20].mxu1 }
 0x2f4   : > { %v1978_v35 = vadd.f32 %v4421_v20, %v1977_v3  ;;  %v1979_v14 = vpop.f32.mrb[21].mxu1 }
 0x2f5   : > { %v1980_v21 = vpop.f32.mrb[22].mxu1 }
 0x2f6   : > { %v1981_v7 = vadd.f32 %v4421_v20, %v1980_v21  ;;  %v1982_v18 = vpop.f32.mrb[23].mxu1  ;;  %v2068_v33 = vmax.f32 %v1978_v35, 0.0 }
 0x2f8   : > { %v2069_v63 = vmax.f32 %v1981_v7, 0.0 }
 0x2fa   : > { %v2094_v6 = vpack.c.bf16 %v2069_v63, %v2068_v33 }
 0x2fb   : > { %v1985_v31 = vpop.f32.mrb[24].mxu1 }
 0x2fc   : > { %v1986_v1 = vadd.f32 %v4421_v20, %v1985_v31  ;;  %v1987_v43 = vpop.f32.mrb[25].mxu1  ;;  %2926 = vmatprep.mubr.msk.bf16.mxu0 %vm1246_vm14, %v2094_v6 }
 0x2fd   : > { %v1988_v52 = vpop.f32.mrb[26].mxu1 }
 0x2fe   : > { %v1989_v44 = vadd.f32 %v4421_v20, %v1988_v52  ;;  %v1990_v48 = vpop.f32.mrb[27].mxu1  ;;  %v2070_v57 = vmax.f32 %v1986_v1, 0.0 }
 0x300   : > { %v2071_v42 = vmax.f32 %v1989_v44, 0.0 }
 0x302   : > { %v2095_v22 = vpack.c.bf16 %v2071_v42, %v2070_v57 }
 0x304   : > { %2927 = vmatmul.mubr.msk.bf16.gmra.mrb[48].mxu0 %vm1246_vm14, %v2095_v22 }
 0x317   : > { %v1993_v15 = vpop.f32.mrb[28].mxu1 }
 0x318   : > { %v1994_v13 = vadd.f32 %v4421_v20, %v1993_v15  ;;  %v1995_v19 = vpop.f32.mrb[29].mxu1 }
 0x319   : > { %v1996_v4 = vpop.f32.mrb[30].mxu1 }
 0x31a   : > { %v1997_v26 = vadd.f32 %v4421_v20, %v1996_v4  ;;  %v1998_v9 = vpop.f32.mrb[31].mxu1  ;;  %v2072_v45 = vmax.f32 %v1994_v13, 0.0 }
 0x31c   : > { %v2073_v24 = vmax.f32 %v1997_v26, 0.0 }
 0x31e   : > { %v2096_v38 = vpack.c.bf16 %v2073_v24, %v2072_v45 }
 0x31f   : > { %v2001_v60 = vpop.f32.mrb[32].mxu1 }
 0x320   : > { %v2002_v2 = vadd.f32 %v4421_v20, %v2001_v60  ;;  %v2003_v5 = vpop.f32.mrb[33].mxu1  ;;  %2930 = vmatprep.mubr.msk.bf16.mxu0 %vm1246_vm14, %v2096_v38  ;;  %v4474_v60 = vld [vmem:[%s4651_s6] ss:$0 sm:$0xff] }
 0x321   : > { %v2004_v59 = vpop.f32.mrb[34].mxu1 }
 0x322   : > { %v2005_v17 = vadd.f32 %v4421_v20, %v2004_v59  ;;  %v2006_v11 = vpop.f32.mrb[35].mxu1  ;;  %v2074_v29 = vmax.f32 %v2002_v2, 0.0  ;;  %v3073_v2 = vld [vmem:[%s3351_s15 + $0x8] sm:$0xff]   ;;  %v3074_v59 = vld [vmem:[%s3351_s15] sm:$0xff]  }
 0x323   : > { %v2330_v5 = vunpack.c.l.bf16 %v3073_v2 }
 0x324   : > { %v2075_v58 = vmax.f32 %v2005_v17, 0.0  ;;  %v2328_v17 = vunpack.c.l.bf16 %v3074_v59 }
 0x326   : > { %v2097_v8 = vpack.c.bf16 %v2075_v58, %v2074_v29 }
 0x327   : > { %v2009_v39 = vpop.f32.mrb[36].mxu1 }
 0x328   : > { %v2010_v0 = vadd.f32 %v4421_v20, %v2009_v39  ;;  %2931 = vmatmul.mubr.msk.bf16.gmra.mrb[52].mxu0 %vm1246_vm14, %v2097_v8  ;;  %v2011_v30 = vpop.f32.mrb[37].mxu1  ;;  %v2329_v8 = vunpack.c.h.bf16 %v3074_v59 }
 0x329   : > { %v2012_v56 = vpop.f32.mrb[38].mxu1 }
 0x32a   : > { %v2013_v16 = vadd.f32 %v4421_v20, %v2012_v56  ;;  %v2014_v25 = vpop.f32.mrb[39].mxu1  ;;  %v2076_v36 = vmax.f32 %v2010_v0, 0.0 }
 0x32c   : > { %v2077_v55 = vmax.f32 %v2013_v16, 0.0 }
 0x32e   : > { %v2098_v10 = vpack.c.bf16 %v2077_v55, %v2076_v36 }
 0x330   : > { %2934 = vmatprep.mubr.msk.bf16.mxu0 %vm1246_vm14, %v2098_v10 }
 0x337   : > { %v2017_v46 = vpop.f32.mrb[40].mxu1 }
 0x338   : > { %v2018_v27 = vadd.f32 %v4421_v20, %v2017_v46  ;;  %v2019_v47 = vpop.f32.mrb[41].mxu1 }
 0x339   : > { %v2020_v41 = vpop.f32.mrb[42].mxu1 }
 0x33a   : > { %v2021_v49 = vadd.f32 %v4421_v20, %v2020_v41  ;;  %v2022_v34 = vpop.f32.mrb[43].mxu1  ;;  %v2078_v40 = vmax.f32 %v2018_v27, 0.0 }
 0x33c   : > { %v2079_v51 = vmax.f32 %v2021_v49, 0.0 }
 0x33e   : > { %v2099_v61 = vpack.c.bf16 %v2079_v51, %v2078_v40 }
 0x33f   : > { %v2025_v32 = vpop.f32.mrb[44].mxu1 }
 0x340   : > { %v2026_v23 = vadd.f32 %v4421_v20, %v2025_v32  ;;  %2935 = vmatmul.mubr.msk.bf16.gmra.mrb[56].mxu0 %vm1246_vm14, %v2099_v61  ;;  %v2027_v62 = vpop.f32.mrb[45].mxu1  ;;  %v3075_v61 = vld [vmem:[%s3351_s15 + $0x18] sm:$0xff]  }
 0x341   : > { %v2028_v53 = vpop.f32.mrb[46].mxu1  ;;  %v2334_v32 = vunpack.c.l.bf16 %v3075_v61  ;;  %v3076_v62 = vld [vmem:[%s3351_s15 + $0x10] sm:$0xff]  }
 0x342   : > { %v2029_v28 = vadd.f32 %v4421_v20, %v2028_v53  ;;  %v2030_v50 = vpop.f32.mrb[47].mxu1  ;;  %v2080_v37 = vmax.f32 %v2026_v23, 0.0  ;;  %v2332_v53 = vunpack.c.l.bf16 %v3076_v62 }
 0x344   : > { %v2081_v54 = vmax.f32 %v2029_v28, 0.0 }
 0x346   : > { %v2100_v12 = vpack.c.bf16 %v2081_v54, %v2080_v37  ;;  %v2335_v37 = vunpack.c.h.bf16 %v3075_v61 }
 0x348   : > { %2938 = vmatprep.mubr.msk.bf16.mxu0 %vm1246_vm14, %v2100_v12 }
 0x353   : > { %v2033_v3 = vpop.f32.mrb[48].mxu1 }
 0x354   : > { %v2034_v35 = vadd.f32 %v4421_v20, %v2033_v3  ;;  %v2035_v14 = vpop.f32.mrb[49].mxu1  ;;  %v2333_v3 = vunpack.c.h.bf16 %v3076_v62 }
 0x355   : > { %v2036_v21 = vpop.f32.mrb[50].mxu1 }
 0x356   : > { %v2037_v7 = vadd.f32 %v4421_v20, %v2036_v21  ;;  %v2038_v18 = vpop.f32.mrb[51].mxu1  ;;  %v2082_v33 = vmax.f32 %v2034_v35, 0.0 }
 0x358   : > { %v2083_v63 = vmax.f32 %v2037_v7, 0.0 }
 0x35a   : > { %v2101_v6 = vpack.c.bf16 %v2083_v63, %v2082_v33 }
 0x35b   : > { %v2041_v31 = vpop.f32.mrb[52].mxu1 }
 0x35c   : > { %v2042_v1 = vadd.f32 %v4421_v20, %v2041_v31  ;;  %v2043_v43 = vpop.f32.mrb[53].mxu1  ;;  %2939 = vmatmul.mubr.msk.bf16.gmra.mrb[60].mxu0 %vm1246_vm14, %v2101_v6 }
 0x35d   : > { %v2044_v52 = vpop.f32.mrb[54].mxu1 }
 0x35e   : > { %v2045_v44 = vadd.f32 %v4421_v20, %v2044_v52  ;;  %v2046_v48 = vpop.f32.mrb[55].mxu1  ;;  %v2084_v57 = vmax.f32 %v2042_v1, 0.0 }
 0x360   : > { %v2085_v42 = vmax.f32 %v2045_v44, 0.0 }
 0x362   : > { %v2102_v22 = vpack.c.bf16 %v2085_v42, %v2084_v57  ;;  %v3077_v42 = vld [vmem:[%s3351_s15 + $0x28] sm:$0xff]  }
 0x363   : > { %v2049_v15 = vpop.f32.mrb[56].mxu1 }
 0x364   : > { %v2050_v13 = vadd.f32 %v4421_v20, %v2049_v15  ;;  %v2051_v19 = vpop.f32.mrb[57].mxu1  ;;  %2942 = vmatprep.mubr.msk.bf16.mxu0 %vm1246_vm14, %v2102_v22  ;;  %v2338_v22 = vunpack.c.l.bf16 %v3077_v42 }
 0x365   : > { %v2052_v4 = vpop.f32.mrb[58].mxu1 }
 0x366   : > { %v2053_v26 = vadd.f32 %v4421_v20, %v2052_v4  ;;  %v2054_v9 = vpop.f32.mrb[59].mxu1  ;;  %v2086_v45 = vmax.f32 %v2050_v13, 0.0  ;;  %v2331_v20 = vunpack.c.h.bf16 %v3073_v2  ;;  %v3078_v13 = vld [vmem:[%s3351_s15 + $0x20] sm:$0xff]  }
 0x367   : > { %v2336_v19 = vunpack.c.l.bf16 %v3078_v13  ;;  %v2339_v9 = vunpack.c.h.bf16 %v3077_v42 }
 0x368   : > { %v2087_v24 = vmax.f32 %v2053_v26, 0.0 }
 0x36a   : > { %v2103_v38 = vpack.c.bf16 %v2087_v24, %v2086_v45 }
 0x36c   : > { %2943 = vmatmul.mubr.msk.bf16.gmra.mrb[64].mxu0 %vm1246_vm14, %v2103_v38  ;;  %v2337_v38 = vunpack.c.h.bf16 %v3078_v13 }
 0x38c   : > { %v2916_v11 = vpop.f32.mrb[36].mxu0 }
 0x38d   : > { %v2210_v29 = vadd.f32 %v2916_v11, %v4474_v60  ;;  %v2201_v58 = vpop.f32.mrb[37].mxu0 }
 0x38e   : > { %v2202_v39 = vadd.f32 %v4474_v60, %v2201_v58  ;;  %v2917_v0 = vpop.f32.mrb[38].mxu0 }
 0x38f   : > { %v2362_v30 = vadd.f32 %v2330_v5, %v2210_v29  ;;  %v2213_v56 = vadd.f32 %v2917_v0, %v4474_v60  ;;  %v2204_v16 = vpop.f32.mrb[39].mxu0 }
 0x390   : > { %v2360_v25 = vadd.f32 %v2328_v17, %v2202_v39  ;;  %v2205_v36 = vadd.f32 %v4474_v60, %v2204_v16 }
 0x391   : > { %v2394_v55 = vmax.f32 %v2362_v30, 0.0  ;;  %v2363_v10 = vadd.f32 %v2331_v20, %v2213_v56 }
 0x392   : > { %v2392_v46 = vmax.f32 %v2360_v25, 0.0  ;;  %v2361_v27 = vadd.f32 %v2329_v8, %v2205_v36  ;;  %v3079_v36 = vld [vmem:[%s3351_s15 + $0x38] sm:$0xff]  }
 0x393   : > { %v2804_v47 = vpack.c.bf16 %v2394_v55, %v2394_v55  ;;  %v2395_v41 = vmax.f32 %v2363_v10, 0.0  ;;  %v2342_v55 = vunpack.c.l.bf16 %v3079_v36 }
 0x394   : > { %v2802_v49 = vpack.c.bf16 %v2392_v46, %v2392_v46  ;;  %v2393_v34 = vmax.f32 %v2361_v27, 0.0  ;;  %v3080_v46 = vld [vmem:[%s3351_s15 + $0x30] sm:$0xff]  }
 0x395   : > { %2555 = vst.msk [vmem:[%s4484_s9 + $0x8] sm:$0xf] %vm2552_vm0, %v2804_v47  ;;  %v2805_v40 = vpack.c.bf16 %v2395_v41, %v2395_v41  ;;  %v2340_v27 = vunpack.c.l.bf16 %v3080_v46 }
 0x396   : > { %2553 = vst.msk [vmem:[%s4484_s9] sm:$0xf] %vm2552_vm0, %v2802_v49  ;;  %v2803_v51 = vpack.c.bf16 %v2393_v34, %v2393_v34  ;;  %v2343_v49 = vunpack.c.h.bf16 %v3079_v36 }
 0x397   : > { %2556 = vst.msk [vmem:[%s4484_s9 + $0xc] sm:$0xf] %vm2552_vm0, %v2805_v40 }
 0x398   : > { %2554 = vst.msk [vmem:[%s4484_s9 + $0x4] sm:$0xf] %vm2552_vm0, %v2803_v51  ;;  %v2341_v51 = vunpack.c.h.bf16 %v3080_v46 }
 0x3a7   : > { %v2920_v23 = vpop.f32.mrb[40].mxu0 }
 0x3a8   : > { %v2226_v28 = vadd.f32 %v2920_v23, %v4474_v60  ;;  %v2217_v50 = vpop.f32.mrb[41].mxu0 }
 0x3a9   : > { %v2218_v54 = vadd.f32 %v4474_v60, %v2217_v50  ;;  %v2921_v12 = vpop.f32.mrb[42].mxu0 }
 0x3aa   : > { %v2366_v35 = vadd.f32 %v2334_v32, %v2226_v28  ;;  %v2229_v14 = vadd.f32 %v2921_v12, %v4474_v60  ;;  %v2220_v21 = vpop.f32.mrb[43].mxu0 }
 0x3ab   : > { %v2364_v7 = vadd.f32 %v2332_v53, %v2218_v54  ;;  %v2221_v18 = vadd.f32 %v4474_v60, %v2220_v21 }
 0x3ac   : > { %v2398_v33 = vmax.f32 %v2366_v35, 0.0  ;;  %v2367_v63 = vadd.f32 %v2335_v37, %v2229_v14 }
 0x3ad   : > { %v2396_v6 = vmax.f32 %v2364_v7, 0.0  ;;  %v2365_v31 = vadd.f32 %v2333_v3, %v2221_v18  ;;  %v3081_v18 = vld [vmem:[%s3351_s15 + $0x48] sm:$0xff]  }
 0x3ae   : > { %v2808_v1 = vpack.c.bf16 %v2398_v33, %v2398_v33  ;;  %v2399_v43 = vmax.f32 %v2367_v63, 0.0  ;;  %v2346_v33 = vunpack.c.l.bf16 %v3081_v18 }
 0x3af   : > { %v2806_v52 = vpack.c.bf16 %v2396_v6, %v2396_v6  ;;  %v2397_v44 = vmax.f32 %v2365_v31, 0.0  ;;  %v3082_v6 = vld [vmem:[%s3351_s15 + $0x40] sm:$0xff]  }
 0x3b0   : > { %2559 = vst.msk [vmem:[%s4484_s9 + $0x18] sm:$0xf] %vm2552_vm0, %v2808_v1  ;;  %v2809_v48 = vpack.c.bf16 %v2399_v43, %v2399_v43  ;;  %v2344_v31 = vunpack.c.l.bf16 %v3082_v6 }
 0x3b1   : > { %2557 = vst.msk [vmem:[%s4484_s9 + $0x10] sm:$0xf] %vm2552_vm0, %v2806_v52  ;;  %v2807_v57 = vpack.c.bf16 %v2397_v44, %v2397_v44  ;;  %v2347_v52 = vunpack.c.h.bf16 %v3081_v18 }
 0x3b2   : > { %2560 = vst.msk [vmem:[%s4484_s9 + $0x1c] sm:$0xf] %vm2552_vm0, %v2809_v48 }
 0x3b3   : > { %2558 = vst.msk [vmem:[%s4484_s9 + $0x14] sm:$0xf] %vm2552_vm0, %v2807_v57  ;;  %v2345_v57 = vunpack.c.h.bf16 %v3082_v6 }
 0x3c3   : > { %v2924_v15 = vpop.f32.mrb[44].mxu0 }
 0x3c4   : > { %v2242_v4 = vadd.f32 %v2924_v15, %v4474_v60  ;;  %v2233_v26 = vpop.f32.mrb[45].mxu0 }
 0x3c5   : > { %v2234_v45 = vadd.f32 %v4474_v60, %v2233_v26  ;;  %v2925_v24 = vpop.f32.mrb[46].mxu0 }
 0x3c6   : > { %v2370_v2 = vadd.f32 %v2338_v22, %v2242_v4  ;;  %v2245_v5 = vadd.f32 %v2925_v24, %v4474_v60  ;;  %v2236_v59 = vpop.f32.mrb[47].mxu0 }
 0x3c7   : > { %v2368_v17 = vadd.f32 %v2336_v19, %v2234_v45  ;;  %v2237_v11 = vadd.f32 %v4474_v60, %v2236_v59 }
 0x3c8   : > { %v2402_v29 = vmax.f32 %v2370_v2, 0.0  ;;  %v2371_v58 = vadd.f32 %v2339_v9, %v2245_v5 }
 0x3c9   : > { %v2400_v20 = vmax.f32 %v2368_v17, 0.0  ;;  %v2369_v8 = vadd.f32 %v2337_v38, %v2237_v11  ;;  %v3083_v11 = vld [vmem:[%s3351_s15 + $0x58] sm:$0xff]  }
 0x3ca   : > { %v2812_v39 = vpack.c.bf16 %v2402_v29, %v2402_v29  ;;  %v2403_v0 = vmax.f32 %v2371_v58, 0.0  ;;  %v2350_v29 = vunpack.c.l.bf16 %v3083_v11 }
 0x3cb   : > { %v2810_v30 = vpack.c.bf16 %v2400_v20, %v2400_v20  ;;  %v2401_v56 = vmax.f32 %v2369_v8, 0.0  ;;  %v3084_v20 = vld [vmem:[%s3351_s15 + $0x50] sm:$0xff]  }
 0x3cc   : > { %2563 = vst.msk [vmem:[%s4484_s9 + $0x28] sm:$0xf] %vm2552_vm0, %v2812_v39  ;;  %v2813_v16 = vpack.c.bf16 %v2403_v0, %v2403_v0  ;;  %v2348_v8 = vunpack.c.l.bf16 %v3084_v20 }
 0x3cd   : > { %2561 = vst.msk [vmem:[%s4484_s9 + $0x20] sm:$0xf] %vm2552_vm0, %v2810_v30  ;;  %v2811_v25 = vpack.c.bf16 %v2401_v56, %v2401_v56  ;;  %v2351_v30 = vunpack.c.h.bf16 %v3083_v11 }
 0x3ce   : > { %2564 = vst.msk [vmem:[%s4484_s9 + $0x2c] sm:$0xf] %vm2552_vm0, %v2813_v16 }
 0x3cf   : > { %2562 = vst.msk [vmem:[%s4484_s9 + $0x24] sm:$0xf] %vm2552_vm0, %v2811_v25  ;;  %v2349_v25 = vunpack.c.h.bf16 %v3084_v20 }
 0x3d7   : > { %v2928_v10 = vpop.f32.mrb[48].mxu0 }
 0x3d8   : > { %v2258_v47 = vadd.f32 %v2928_v10, %v4474_v60  ;;  %v2249_v41 = vpop.f32.mrb[49].mxu0 }
 0x3d9   : > { %v2250_v34 = vadd.f32 %v4474_v60, %v2249_v41  ;;  %v2929_v40 = vpop.f32.mrb[50].mxu0 }
 0x3da   : > { %v2374_v61 = vadd.f32 %v2342_v55, %v2258_v47  ;;  %v2261_v32 = vadd.f32 %v2929_v40, %v4474_v60  ;;  %v2252_v23 = vpop.f32.mrb[51].mxu0 }
 0x3db   : > { %v2372_v62 = vadd.f32 %v2340_v27, %v2250_v34  ;;  %v2253_v53 = vadd.f32 %v4474_v60, %v2252_v23 }
 0x3dc   : > { %v2406_v28 = vmax.f32 %v2374_v61, 0.0  ;;  %v2375_v50 = vadd.f32 %v2343_v49, %v2261_v32 }
 0x3dd   : > { %v2404_v37 = vmax.f32 %v2372_v62, 0.0  ;;  %v2373_v54 = vadd.f32 %v2341_v51, %v2253_v53  ;;  %v3085_v53 = vld [vmem:[%s3351_s15 + $0x68] sm:$0xff]  }
 0x3de   : > { %v2816_v12 = vpack.c.bf16 %v2406_v28, %v2406_v28  ;;  %v2407_v3 = vmax.f32 %v2375_v50, 0.0  ;;  %v2354_v28 = vunpack.c.l.bf16 %v3085_v53 }
 0x3df   : > { %v2814_v35 = vpack.c.bf16 %v2404_v37, %v2404_v37  ;;  %v2405_v14 = vmax.f32 %v2373_v54, 0.0  ;;  %v3086_v37 = vld [vmem:[%s3351_s15 + $0x60] sm:$0xff]  }
 0x3e0   : > { %2567 = vst.msk [vmem:[%s4484_s9 + $0x38] sm:$0xf] %vm2552_vm0, %v2816_v12  ;;  %v2817_v21 = vpack.c.bf16 %v2407_v3, %v2407_v3  ;;  %v2352_v54 = vunpack.c.l.bf16 %v3086_v37 }
 0x3e1   : > { %2565 = vst.msk [vmem:[%s4484_s9 + $0x30] sm:$0xf] %vm2552_vm0, %v2814_v35  ;;  %v2815_v7 = vpack.c.bf16 %v2405_v14, %v2405_v14  ;;  %v2355_v35 = vunpack.c.h.bf16 %v3085_v53 }
 0x3e2   : > { %2568 = vst.msk [vmem:[%s4484_s9 + $0x3c] sm:$0xf] %vm2552_vm0, %v2817_v21 }
 0x3e3   : > { %2566 = vst.msk [vmem:[%s4484_s9 + $0x34] sm:$0xf] %vm2552_vm0, %v2815_v7  ;;  %v2353_v7 = vunpack.c.h.bf16 %v3086_v37 }
 0x3fb   : > { %v2932_v63 = vpop.f32.mrb[52].mxu0 }
 0x3fc   : > { %v2274_v1 = vadd.f32 %v2932_v63, %v4474_v60  ;;  %v2265_v43 = vpop.f32.mrb[53].mxu0 }
 0x3fd   : > { %v2266_v44 = vadd.f32 %v4474_v60, %v2265_v43  ;;  %v2933_v48 = vpop.f32.mrb[54].mxu0 }
 0x3fe   : > { %v2378_v42 = vadd.f32 %v2346_v33, %v2274_v1  ;;  %v2277_v22 = vadd.f32 %v2933_v48, %v4474_v60  ;;  %v2268_v15 = vpop.f32.mrb[55].mxu0 }
 0x3ff   : > { %v2376_v13 = vadd.f32 %v2344_v31, %v2266_v44  ;;  %v2269_v19 = vadd.f32 %v4474_v60, %v2268_v15 }
 0x400   : > { %v2410_v4 = vmax.f32 %v2378_v42, 0.0  ;;  %v2379_v26 = vadd.f32 %v2347_v52, %v2277_v22 }
 0x401   : > { %v2408_v9 = vmax.f32 %v2376_v13, 0.0  ;;  %v2377_v45 = vadd.f32 %v2345_v57, %v2269_v19  ;;  %v3087_v19 = vld [vmem:[%s3351_s15 + $0x78] sm:$0xff]  }
 0x402   : > { %v2820_v24 = vpack.c.bf16 %v2410_v4, %v2410_v4  ;;  %v2411_v38 = vmax.f32 %v2379_v26, 0.0  ;;  %v2358_v4 = vunpack.c.l.bf16 %v3087_v19 }
 0x403   : > { %v2818_v2 = vpack.c.bf16 %v2408_v9, %v2408_v9  ;;  %v2409_v5 = vmax.f32 %v2377_v45, 0.0  ;;  %v3088_v9 = vld [vmem:[%s3351_s15 + $0x70] sm:$0xff]   ;;  %s2599_s15 = sshll.u32 %s4484_s9, 4  ;;  %s4595_s15 = int_to_ptr.vmem [resolvable:$true] %s2599_s15 }
 0x404   : > { %2571 = vst.msk [vmem:[%s4484_s9 + $0x48] sm:$0xf] %vm2552_vm0, %v2820_v24  ;;  %v2821_v59 = vpack.c.bf16 %v2411_v38, %v2411_v38  ;;  %v2356_v45 = vunpack.c.l.bf16 %v3088_v9  ;;  %s3119_s8 = scalar_lea.vmem %s4595_s15, 2048  ;;  %p3126_p8 = scmp.lt.s32.totalorder %s4595_s15, %s3124_s22 }
 0x405   : > { %2569 = vst.msk [vmem:[%s4484_s9 + $0x40] sm:$0xf] %vm2552_vm0, %v2818_v2  ;;  %v2819_v17 = vpack.c.bf16 %v2409_v5, %v2409_v5  ;;  %v2359_v2 = vunpack.c.h.bf16 %v3087_v19  ;;  %p3120_p6 = scmp.ne.s32.totalorder %s4595_s15, %s3119_s8  ;;  %p3127_p10 = scmp.lt.s32.totalorder %s3125_s23, %s3119_s8 }
 0x406   : > { %2572 = vst.msk [vmem:[%s4484_s9 + $0x4c] sm:$0xf] %vm2552_vm0, %v2821_v59 }
 0x407   : > { %2570 = vst.msk [vmem:[%s4484_s9 + $0x44] sm:$0xf] %vm2552_vm0, %v2819_v17  ;;  %v2357_v17 = vunpack.c.h.bf16 %v3088_v9  ;;  %p3121_p12 = pnand %p3120_p6, %p4691_p11  ;;  %p3128_p0 = por %p3127_p10, %p3126_p8 }
 0x409   : > { %p3122_p13 = pneg %p3121_p12 }
 0x40b   : > { %p3129_p2 = pnand %p3128_p0, %p3122_p13 }
 0x413   : > { %v2936_v58 = vpop.f32.mrb[56].mxu0 }
 0x414   : > { %v2290_v39 = vadd.f32 %v2936_v58, %v4474_v60  ;;  %v2281_v0 = vpop.f32.mrb[57].mxu0 }
 0x415   : > { %v2282_v56 = vadd.f32 %v4474_v60, %v2281_v0  ;;  %v2937_v16 = vpop.f32.mrb[58].mxu0 }
 0x416   : > { %v2382_v36 = vadd.f32 %v2350_v29, %v2290_v39  ;;  %v2293_v55 = vadd.f32 %v2937_v16, %v4474_v60  ;;  %v2284_v10 = vpop.f32.mrb[59].mxu0 }
 0x417   : > { %v2380_v46 = vadd.f32 %v2348_v8, %v2282_v56  ;;  %v2285_v27 = vadd.f32 %v4474_v60, %v2284_v10 }
 0x418   : > { %v2414_v47 = vmax.f32 %v2382_v36, 0.0  ;;  %v2383_v41 = vadd.f32 %v2351_v30, %v2293_v55 }
 0x419   : > { %v2412_v49 = vmax.f32 %v2380_v46, 0.0  ;;  %v2381_v34 = vadd.f32 %v2349_v25, %v2285_v27 }
 0x41a   : > { %v2824_v40 = vpack.c.bf16 %v2414_v47, %v2414_v47  ;;  %v2415_v51 = vmax.f32 %v2383_v41, 0.0 }
 0x41b   : > { %v2822_v61 = vpack.c.bf16 %v2412_v49, %v2412_v49  ;;  %v2413_v32 = vmax.f32 %v2381_v34, 0.0 }
 0x41c   : > { %2575 = vst.msk [vmem:[%s4484_s9 + $0x58] sm:$0xf] %vm2552_vm0, %v2824_v40  ;;  %v2825_v23 = vpack.c.bf16 %v2415_v51, %v2415_v51 }
 0x41d   : > { %2573 = vst.msk [vmem:[%s4484_s9 + $0x50] sm:$0xf] %vm2552_vm0, %v2822_v61  ;;  %v2823_v62 = vpack.c.bf16 %v2413_v32, %v2413_v32 }
 0x41e   : > { %2576 = vst.msk [vmem:[%s4484_s9 + $0x5c] sm:$0xf] %vm2552_vm0, %v2825_v23 }
 0x41f   : > { %2574 = vst.msk [vmem:[%s4484_s9 + $0x54] sm:$0xf] %vm2552_vm0, %v2823_v62 }
 0x42f   : > { %v2940_v50 = vpop.f32.mrb[60].mxu0 }
 0x430   : > { %v2306_v12 = vadd.f32 %v2940_v50, %v4474_v60  ;;  %v2297_v3 = vpop.f32.mrb[61].mxu0 }
 0x431   : > { %v2298_v14 = vadd.f32 %v4474_v60, %v2297_v3  ;;  %v2941_v21 = vpop.f32.mrb[62].mxu0 }
 0x432   : > { %v2386_v18 = vadd.f32 %v2354_v28, %v2306_v12  ;;  %v2309_v33 = vadd.f32 %v2941_v21, %v4474_v60  ;;  %v2300_v63 = vpop.f32.mrb[63].mxu0 }
 0x433   : > { %v2384_v6 = vadd.f32 %v2352_v54, %v2298_v14  ;;  %v2301_v31 = vadd.f32 %v4474_v60, %v2300_v63 }
 0x434   : > { %v2418_v1 = vmax.f32 %v2386_v18, 0.0  ;;  %v2387_v43 = vadd.f32 %v2355_v35, %v2309_v33 }
 0x435   : > { %v2416_v52 = vmax.f32 %v2384_v6, 0.0  ;;  %v2385_v44 = vadd.f32 %v2353_v7, %v2301_v31 }
 0x436   : > { %v2828_v48 = vpack.c.bf16 %v2418_v1, %v2418_v1  ;;  %v2419_v57 = vmax.f32 %v2387_v43, 0.0 }
 0x437   : > { %v2826_v42 = vpack.c.bf16 %v2416_v52, %v2416_v52  ;;  %v2417_v22 = vmax.f32 %v2385_v44, 0.0 }
 0x438   : > { %2579 = vst.msk [vmem:[%s4484_s9 + $0x68] sm:$0xf] %vm2552_vm0, %v2828_v48  ;;  %v2829_v15 = vpack.c.bf16 %v2419_v57, %v2419_v57 }
 0x439   : > { %2577 = vst.msk [vmem:[%s4484_s9 + $0x60] sm:$0xf] %vm2552_vm0, %v2826_v42  ;;  %v2827_v13 = vpack.c.bf16 %v2417_v22, %v2417_v22 }
 0x43a   : > { %2580 = vst.msk [vmem:[%s4484_s9 + $0x6c] sm:$0xf] %vm2552_vm0, %v2829_v15 }
 0x43b   : > { %2578 = vst.msk [vmem:[%s4484_s9 + $0x64] sm:$0xf] %vm2552_vm0, %v2827_v13 }
 0x43f   : > { %v2944_v26 = vpop.f32.mrb[64].mxu0 }
 0x440   : > { %v2322_v24 = vadd.f32 %v2944_v26, %v4474_v60  ;;  %v2313_v38 = vpop.f32.mrb[65].mxu0 }
 0x441   : > { %v2314_v5 = vadd.f32 %v4474_v60, %v2313_v38  ;;  %v2945_v59 = vpop.f32.mrb[66].mxu0 }
 0x442   : > { %v2390_v11 = vadd.f32 %v2358_v4, %v2322_v24  ;;  %v2325_v29 = vadd.f32 %v2945_v59, %v4474_v60  ;;  %v2316_v58 = vpop.f32.mrb[67].mxu0 }
 0x443   : > { %v2388_v20 = vadd.f32 %v2356_v45, %v2314_v5  ;;  %v2317_v8 = vadd.f32 %v4474_v60, %v2316_v58 }
 0x444   : > { %v2422_v39 = vmax.f32 %v2390_v11, 0.0  ;;  %v2391_v0 = vadd.f32 %v2359_v2, %v2325_v29 }
 0x445   : > { %v2420_v30 = vmax.f32 %v2388_v20, 0.0  ;;  %v2389_v56 = vadd.f32 %v2357_v17, %v2317_v8 }
 0x446   : > { %v2832_v16 = vpack.c.bf16 %v2422_v39, %v2422_v39  ;;  %v2423_v25 = vmax.f32 %v2391_v0, 0.0 }
 0x447   : > { %v2830_v36 = vpack.c.bf16 %v2420_v30, %v2420_v30  ;;  %v2421_v55 = vmax.f32 %v2389_v56, 0.0 }
 0x448   : > { %2583 = vst.msk [vmem:[%s4484_s9 + $0x78] sm:$0xf] %vm2552_vm0, %v2832_v16  ;;  %v2833_v10 = vpack.c.bf16 %v2423_v25, %v2423_v25 }
 0x449   : > { %2581 = vst.msk [vmem:[%s4484_s9 + $0x70] sm:$0xf] %vm2552_vm0, %v2830_v36  ;;  %v2831_v60 = vpack.c.bf16 %v2421_v55, %v2421_v55 }
 0x44a   : > { %2584 = vst.msk [vmem:[%s4484_s9 + $0x7c] sm:$0xf] %vm2552_vm0, %v2833_v10 }
 0x44b   : > { %2582 = vst.msk [vmem:[%s4484_s9 + $0x74] sm:$0xf] %vm2552_vm0, %v2831_v60 }
 0x44c   : > { %3132 = shalt.err (!%p3129_p2)
}
 0x44d   : > { %s3133_s29 = scalar_lea.hbm %s4591_s19, 2048  ;;  %s3137_s17 = scalar_lea.hbm %s4652_s7, 4096 }
 0x44e   : > { %p3134_p4 = scmp.ne.s32.totalorder %s4591_s19, %s3133_s29  ;;  %p3138_p9 = scmp.lt.u32.totalorder %s4591_s19, %s4652_s7 }
 0x44f   : > { %p3139_p1 = scmp.lt.u32.totalorder %s3137_s17, %s3133_s29  ;;  %p3141_p6 = scmp.lt.u32.totalorder %s3133_s29, %s4591_s19 }
 0x450   : > { %p3135_p5 = pnand %p3134_p4, %p4691_p11 }
 0x451   : > { %p3140_p3 = por %p3139_p1, %p3138_p9 }
 0x452   : > { %p3136_p7 = pneg %p3135_p5 }
 0x453   : > { %p3142_p12 = por %p3141_p6, %p3140_p3 }
 0x455   : > { %p3143_p13 = pnand %p3142_p12, %p3136_p7 }
 0x457   : > { %3146 = shalt.err (!%p3143_p13)
}
 0x458   : > { %s3200_s8 = smov 4  }
 0x459   : > { %2966 = dma.vmem_to_hbm [thread:$0]  (%p4691_p11), %s4595_s15, 2048, %s4591_s19, %s2586_s28, %s3198_s21, %s3198_s21, %s3200_s8  }
 0x45a PF: > { %s2614_s11 = sand.u32 1, %s3173_s24   ;;  %p4692_p8 = scmp.ne.s32.totalorder %s4669_s14, 0 }
 0x45b   : > { %p4693_p10 = scmp.ge.s32.totalorder %s3185_s27, 2  ;;  %s2615_s22 = scalar_lea.sflag [#allocation4], %s2614_s11 }
 0x45d   : > { %p2973_p0 = pnand %p4693_p10, %p4692_p8 }
 0x45f   : > { %3168 = dma.done.wait (!%p2973_p0), %s2615_s22, 2048  }
 0x460   : > { %3170 = vsyncadd (!%p2973_p0), %s2615_s22, 4294965248  ;;  %p20_p2 = scmp.ge.s32.totalorder %s3266_s30, 4   ;;  %s4694_s24 = smov %s3177_s25 }
 0x461   : > { %s4695_s25 = smov %s3181_s26  ;;  %s4696_s26 = smov %s3278_s10 }
 0x462   : > { %s4697_s27 = smov %s3266_s30  ;;  %22 = sbr.rel (!%p20_p2) target bundleno = 5 (0x5), region = 93 }
 0x469   :  { %2620 = vsyncpa [#allocation3], 1 }
 0x46a   :  { %2622 = vsyncpa [#allocation3 + $0x1], 1 }
 0x46b   :  { %2623 = vsyncpa [#allocation4], 1 }
 0x46c   :  { %2625 = vsyncpa [#allocation4 + $0x1], 1 }

</bundles_post_ra>
